<compile_context>
chip_gen: v7x
topology: tpu7x:2x2x1
jax: 0.10.0
libtpu: 0.0.40
codegen_flags: <defaults>
</compile_context>

<pallas_src>
import jax
import jax.numpy as jnp
from jax.experimental import pallas as pl
from jax.experimental.pallas import tpu as pltpu

# ------------------------- configuration (small, synthetic) -------------------
BATCH = 256                 # demo batch (many forecast windows at once)
BTILE = 128                 # rows per grid step (MXU-native on v5e, 2 steps -> 2 TCs on v7x)
FORECAST_LEN = 8            # f_b_dim[0]
BACKCAST_LEN = 16           # f_b_dim[1]
HIDDEN = 32                 # hidden_layer_dim
THETA_DIM = 8               # thetas_dims[i] (same for forecast/backcast thetas)
BLOCKS_PER_STACK = (2, 2)   # num_blocks_per_stack, 2 stacks of GenericNBeatsBlock
NUM_HIDDEN_LAYERS = 2       # num_hidden_layers
TOTAL_BLOCKS = sum(BLOCKS_PER_STACK)

FB = FORECAST_LEN + BACKCAST_LEN           # fused forecast|backcast width = 24
TD2 = 2 * THETA_DIM                        # fused theta width = 16

# packed-weight row layout (per block), all offsets multiples of 16 (bf16 tile)
R_IN = 0                                   # (BACKCAST_LEN, HIDDEN)
R_H = R_IN + BACKCAST_LEN                  # NUM_HIDDEN_LAYERS x (HIDDEN, HIDDEN)
R_TH = R_H + NUM_HIDDEN_LAYERS * HIDDEN    # (HIDDEN, 2*THETA_DIM)   [theta_f | theta_b]
R_G = R_TH + HIDDEN                        # (2*THETA_DIM, FC+BC)    block-diagonal g
ROWS_PER_BLOCK = R_G + TD2                 # = 128 for this config
WMAX = max(HIDDEN, TD2, FB)                # = 32
NUM_BIAS_ROWS = 2 + NUM_HIDDEN_LAYERS      # b_in, b_h..., b_g(fused)


# ------------------------------- Pallas kernel --------------------------------
def nbeats_kernel(x_ref, w_ref, b_ref, out_ref):
    # x_ref : (BTILE, BACKCAST_LEN)              f32
    # w_ref : (TOTAL_BLOCKS, ROWS_PER_BLOCK, WMAX)  bf16 packed weights
    # b_ref : (TOTAL_BLOCKS, NUM_BIAS_ROWS, WMAX)   f32  packed biases
    # out_ref: (BTILE, FORECAST_LEN + BACKCAST_LEN) f32  [forecast | residual]
    resid = x_ref[...]
    forecast = jnp.zeros((BTILE, FORECAST_LEN), jnp.float32)

    # Flat static loop over all blocks of all stacks: stack boundaries do not
    # change the math (forecast globally accumulated, residual sequentially
    # reduced), matching NBeats.forward + Stack.forward.
    for blk in range(TOTAL_BLOCKS):
        # input FC layer + ReLU (bf16 matmul, f32 accumulate, f32 elementwise)
        h = jnp.dot(resid.astype(jnp.bfloat16),
                    w_ref[blk, R_IN:R_IN + BACKCAST_LEN, :HIDDEN],
                    preferred_element_type=jnp.float32)
        h = jnp.maximum(h + b_ref[blk, 0:1, :HIDDEN], 0.0)

        # hidden FC layers + ReLU
        for l in range(NUM_HIDDEN_LAYERS):
            r = R_H + l * HIDDEN
            h = jnp.dot(h.astype(jnp.bfloat16),
                        w_ref[blk, r:r + HIDDEN, :HIDDEN],
                        preferred_element_type=jnp.float32)
            h = jnp.maximum(h + b_ref[blk, 1 + l:2 + l, :HIDDEN], 0.0)

        # fused theta projection: [theta_f | theta_b]  (bias-free)
        theta = jnp.dot(h.astype(jnp.bfloat16),
                        w_ref[blk, R_TH:R_TH + HIDDEN, :TD2],
                        preferred_element_type=jnp.float32)

        # fused g projection with block-diagonal weight: [forecast_blk | backcast_blk]
        fb = jnp.dot(theta.astype(jnp.bfloat16),
                     w_ref[blk, R_G:R_G + TD2, :FB],
                     preferred_element_type=jnp.float32)
        fb = fb + b_ref[blk, 1 + NUM_HIDDEN_LAYERS:2 + NUM_HIDDEN_LAYERS, :FB]

        forecast = forecast + fb[:, :FORECAST_LEN]
        resid = resid - fb[:, FORECAST_LEN:]

    out_ref[:, :FORECAST_LEN] = forecast
    out_ref[:, FORECAST_LEN:] = resid


def nbeats_forward(x, w_packed, b_packed):
    n_tiles = BATCH // BTILE
    out = pl.pallas_call(
        nbeats_kernel,
        out_shape=jax.ShapeDtypeStruct((BATCH, FB), jnp.float32),
        grid=(n_tiles,),
        in_specs=[
            pl.BlockSpec((BTILE, BACKCAST_LEN), lambda i: (i, 0)),
            pl.BlockSpec((TOTAL_BLOCKS, ROWS_PER_BLOCK, WMAX), lambda i: (0, 0, 0)),
            pl.BlockSpec((TOTAL_BLOCKS, NUM_BIAS_ROWS, WMAX), lambda i: (0, 0, 0)),
        ],
        out_specs=pl.BlockSpec((BTILE, FB), lambda i: (i, 0)),
        compiler_params=pltpu.CompilerParams(
            dimension_semantics=("parallel",)),
    )(x, w_packed, b_packed)
    return out[:, :FORECAST_LEN], out[:, FORECAST_LEN:]


# ------------------------ deterministic parameter init ------------------------
def xavier_uniform(key, shape):
    fan_in, fan_out = shape[-2], shape[-1]
    bound = (6.0 / (fan_in + fan_out)) ** 0.5
    return jax.random.uniform(key, shape, jnp.float32, -bound, bound)


def init_params(key):
    ks = jax.random.split(key, 8)
    w_in = xavier_uniform(ks[0], (TOTAL_BLOCKS, BACKCAST_LEN, HIDDEN))
    b_in = 0.05 * jax.random.normal(ks[5], (TOTAL_BLOCKS, 1, HIDDEN), jnp.float32)
    w_h = xavier_uniform(ks[1], (TOTAL_BLOCKS * NUM_HIDDEN_LAYERS, HIDDEN, HIDDEN))
    b_h = 0.05 * jax.random.normal(ks[6], (TOTAL_BLOCKS * NUM_HIDDEN_LAYERS, 1, HIDDEN),
                                   jnp.float32)
    w_tf = xavier_uniform(ks[2], (TOTAL_BLOCKS, HIDDEN, THETA_DIM))
    w_tb = xavier_uniform(ks[3], (TOTAL_BLOCKS, HIDDEN, THETA_DIM))
    kgf, kgb = jax.random.split(ks[4])
    w_gf = xavier_uniform(kgf, (TOTAL_BLOCKS, THETA_DIM, FORECAST_LEN))
    b_gf = 0.05 * jax.random.normal(ks[7], (TOTAL_BLOCKS, 1, FORECAST_LEN), jnp.float32)
    w_gb = xavier_uniform(jax.random.fold_in(kgb, 1),
                          (TOTAL_BLOCKS, THETA_DIM, BACKCAST_LEN))
    b_gb = 0.05 * jax.random.normal(jax.random.fold_in(kgb, 2),
                                    (TOTAL_BLOCKS, 1, BACKCAST_LEN), jnp.float32)
    return (w_in, b_in, w_h, b_h, w_tf, w_tb, w_gf, b_gf, w_gb, b_gb)


def pack_params(params):
    """Pack per-block weights into one bf16 slab and biases into one f32 slab."""
    w_in, b_in, w_h, b_h, w_tf, w_tb, w_gf, b_gf, w_gb, b_gb = params
    W = jnp.zeros((TOTAL_BLOCKS, ROWS_PER_BLOCK, WMAX), jnp.float32)
    B = jnp.zeros((TOTAL_BLOCKS, NUM_BIAS_ROWS, WMAX), jnp.float32)
    for blk in range(TOTAL_BLOCKS):
        W = W.at[blk, R_IN:R_IN + BACKCAST_LEN, :HIDDEN].set(w_in[blk])
        B = B.at[blk, 0, :HIDDEN].set(b_in[blk, 0])
        for l in range(NUM_HIDDEN_LAYERS):
            r = R_H + l * HIDDEN
            W = W.at[blk, r:r + HIDDEN, :HIDDEN].set(w_h[blk * NUM_HIDDEN_LAYERS + l])
            B = B.at[blk, 1 + l, :HIDDEN].set(b_h[blk * NUM_HIDDEN_LAYERS + l, 0])
        # fused theta weights [theta_f | theta_b]
        W = W.at[blk, R_TH:R_TH + HIDDEN, :THETA_DIM].set(w_tf[blk])
        W = W.at[blk, R_TH:R_TH + HIDDEN, THETA_DIM:TD2].set(w_tb[blk])
        # block-diagonal fused g weights (off-diagonal exactly zero)
        W = W.at[blk, R_G:R_G + THETA_DIM, :FORECAST_LEN].set(w_gf[blk])
        W = W.at[blk, R_G + THETA_DIM:R_G + TD2, FORECAST_LEN:FB].set(w_gb[blk])
        B = B.at[blk, 1 + NUM_HIDDEN_LAYERS, :FORECAST_LEN].set(b_gf[blk, 0])
        B = B.at[blk, 1 + NUM_HIDDEN_LAYERS, FORECAST_LEN:FB].set(b_gb[blk, 0])
    return W.astype(jnp.bfloat16), B


# ------------------------------ pure-JAX reference -----------------------------
def nbeats_ref(x, params):
    """Reference with identical bf16-matmul / f32-accumulate numerics."""
    w_in, b_in, w_h, b_h, w_tf, w_tb, w_gf, b_gf, w_gb, b_gb = params
    bf = lambda a: a.astype(jnp.bfloat16)
    resid = x
    forecast = jnp.zeros((x.shape[0], FORECAST_LEN), jnp.float32)
    for blk in range(TOTAL_BLOCKS):
        h = jnp.dot(bf(resid), bf(w_in[blk]),
                    preferred_element_type=jnp.float32) + b_in[blk]
        h = jnp.maximum(h, 0.0)
        for l in range(NUM_HIDDEN_LAYERS):
            idx = blk * NUM_HIDDEN_LAYERS + l
            h = jnp.dot(bf(h), bf(w_h[idx]),
                        preferred_element_type=jnp.float32) + b_h[idx]
            h = jnp.maximum(h, 0.0)
        theta_f = jnp.dot(bf(h), bf(w_tf[blk]), preferred_element_type=jnp.float32)
        theta_b = jnp.dot(bf(h), bf(w_tb[blk]), preferred_element_type=jnp.float32)
        forecast = forecast + jnp.dot(bf(theta_f), bf(w_gf[blk]),
                                      preferred_element_type=jnp.float32) + b_gf[blk]
        resid = resid - (jnp.dot(bf(theta_b), bf(w_gb[blk]),
                                 preferred_element_type=jnp.float32) + b_gb[blk])
    return forecast, resid


if __name__ == "__main__":
    key = jax.random.PRNGKey(0)
    kx, kp = jax.random.split(key)
    x = jax.random.normal(kx, (BATCH, BACKCAST_LEN), jnp.float32)
    params = init_params(kp)
    w_packed, b_packed = pack_params(params)

    forecast, residuals = jax.block_until_ready(nbeats_forward(x, w_packed, b_packed))

    f_ref, r_ref = nbeats_ref(x, params)
    assert forecast.shape == (BATCH, FORECAST_LEN)
    assert residuals.shape == (BATCH, BACKCAST_LEN)
    assert jnp.allclose(forecast, f_ref, atol=1e-2, rtol=1e-2)
    assert jnp.allclose(residuals, r_ref, atol=1e-2, rtol=1e-2)

    print("KERNEL_OK")
</pallas_src>

<mosaic_0001>
module attributes {stable_mosaic.version = 11 : i64} {
  func.func @nbeats_kernel(%arg0: i32, %arg1: memref<128x16xf32, #tpu.memory_space<vmem>>, %arg2: memref<4x128x32xbf16, #tpu.memory_space<vmem>>, %arg3: memref<4x4x32xf32, #tpu.memory_space<vmem>>, %arg4: memref<128x24xf32, #tpu.memory_space<vmem>>) attributes {dimension_semantics = [#tpu.dimension_semantics<parallel>], iteration_bounds = array<i64: 2>, scalar_prefetch = 0 : i64, scratch_operands = 0 : i64, tpu.core_type = #tpu.core_type<tc>, window_params = [{transform_indices = @transform_0, window_bounds = array<i64: 128, 16>}, {pipeline_mode = #tpu.pipeline_mode<synchronous>, transform_indices = @transform_1, window_bounds = array<i64: 4, 128, 32>}, {pipeline_mode = #tpu.pipeline_mode<synchronous>, transform_indices = @transform_2, window_bounds = array<i64: 4, 4, 32>}, {transform_indices = @transform_3, window_bounds = array<i64: 128, 24>}]} {
    %c0 = arith.constant 0 : index
    %c0_0 = arith.constant 0 : index
    %0 = vector.load %arg1[%c0, %c0_0] : memref<128x16xf32, #tpu.memory_space<vmem>>, vector<128x16xf32>
    %cst = arith.constant 0.000000e+00 : f32
    %1 = vector.broadcast %cst : f32 to vector<128x8xf32>
    %2 = arith.truncf %0 : vector<128x16xf32> to vector<128x16xbf16>
    %c0_1 = arith.constant 0 : index
    %c0_2 = arith.constant 0 : index
    %c0_3 = arith.constant 0 : index
    %3 = vector.load %arg2[%c0_1, %c0_2, %c0_3] : memref<4x128x32xbf16, #tpu.memory_space<vmem>>, vector<1x16x32xbf16>
    %4 = vector.shape_cast %3 : vector<1x16x32xbf16> to vector<16x32xbf16>
    %cst_4 = arith.constant dense<0.000000e+00> : vector<128x32xf32>
    %5 = tpu.matmul %2, %4, %cst_4 {dimension_numbers = #tpu.dot_dimension_numbers<[1], [0], [0], [1], [0, 0, 1, 1], [], []>} : vector<128x16xbf16>, vector<16x32xbf16>, vector<128x32xf32> -> vector<128x32xf32>
    %c0_5 = arith.constant 0 : index
    %c0_6 = arith.constant 0 : index
    %c0_7 = arith.constant 0 : index
    %6 = vector.load %arg3[%c0_5, %c0_6, %c0_7] : memref<4x4x32xf32, #tpu.memory_space<vmem>>, vector<1x1x32xf32>
    %7 = vector.shape_cast %6 : vector<1x1x32xf32> to vector<1x32xf32>
    %8 = vector.broadcast %7 : vector<1x32xf32> to vector<128x32xf32>
    %9 = arith.addf %5, %8 : vector<128x32xf32>
    %cst_8 = arith.constant 0.000000e+00 : f32
    %10 = vector.broadcast %cst_8 : f32 to vector<128x32xf32>
    %11 = arith.maximumf %9, %10 : vector<128x32xf32>
    %12 = arith.truncf %11 : vector<128x32xf32> to vector<128x32xbf16>
    %c0_9 = arith.constant 0 : index
    %c16 = arith.constant 16 : index
    %c0_10 = arith.constant 0 : index
    %13 = vector.load %arg2[%c0_9, %c16, %c0_10] : memref<4x128x32xbf16, #tpu.memory_space<vmem>>, vector<1x32x32xbf16>
    %14 = vector.shape_cast %13 : vector<1x32x32xbf16> to vector<32x32xbf16>
    %cst_11 = arith.constant dense<0.000000e+00> : vector<128x32xf32>
    %15 = tpu.matmul %12, %14, %cst_11 {dimension_numbers = #tpu.dot_dimension_numbers<[1], [0], [0], [1], [0, 0, 1, 1], [], []>} : vector<128x32xbf16>, vector<32x32xbf16>, vector<128x32xf32> -> vector<128x32xf32>
    %c0_12 = arith.constant 0 : index
    %c1 = arith.constant 1 : index
    %c0_13 = arith.constant 0 : index
    %16 = vector.load %arg3[%c0_12, %c1, %c0_13] : memref<4x4x32xf32, #tpu.memory_space<vmem>>, vector<1x1x32xf32>
    %17 = vector.shape_cast %16 : vector<1x1x32xf32> to vector<1x32xf32>
    %18 = vector.broadcast %17 : vector<1x32xf32> to vector<128x32xf32>
    %19 = arith.addf %15, %18 : vector<128x32xf32>
    %cst_14 = arith.constant 0.000000e+00 : f32
    %20 = vector.broadcast %cst_14 : f32 to vector<128x32xf32>
    %21 = arith.maximumf %19, %20 : vector<128x32xf32>
    %22 = arith.truncf %21 : vector<128x32xf32> to vector<128x32xbf16>
    %c0_15 = arith.constant 0 : index
    %c48 = arith.constant 48 : index
    %c0_16 = arith.constant 0 : index
    %23 = vector.load %arg2[%c0_15, %c48, %c0_16] : memref<4x128x32xbf16, #tpu.memory_space<vmem>>, vector<1x32x32xbf16>
    %24 = vector.shape_cast %23 : vector<1x32x32xbf16> to vector<32x32xbf16>
    %cst_17 = arith.constant dense<0.000000e+00> : vector<128x32xf32>
    %25 = tpu.matmul %22, %24, %cst_17 {dimension_numbers = #tpu.dot_dimension_numbers<[1], [0], [0], [1], [0, 0, 1, 1], [], []>} : vector<128x32xbf16>, vector<32x32xbf16>, vector<128x32xf32> -> vector<128x32xf32>
    %c0_18 = arith.constant 0 : index
    %c2 = arith.constant 2 : index
    %c0_19 = arith.constant 0 : index
    %26 = vector.load %arg3[%c0_18, %c2, %c0_19] : memref<4x4x32xf32, #tpu.memory_space<vmem>>, vector<1x1x32xf32>
    %27 = vector.shape_cast %26 : vector<1x1x32xf32> to vector<1x32xf32>
    %28 = vector.broadcast %27 : vector<1x32xf32> to vector<128x32xf32>
    %29 = arith.addf %25, %28 : vector<128x32xf32>
    %cst_20 = arith.constant 0.000000e+00 : f32
    %30 = vector.broadcast %cst_20 : f32 to vector<128x32xf32>
    %31 = arith.maximumf %29, %30 : vector<128x32xf32>
    %32 = arith.truncf %31 : vector<128x32xf32> to vector<128x32xbf16>
    %c0_21 = arith.constant 0 : index
    %c80 = arith.constant 80 : index
    %c0_22 = arith.constant 0 : index
    %33 = vector.load %arg2[%c0_21, %c80, %c0_22] : memref<4x128x32xbf16, #tpu.memory_space<vmem>>, vector<1x32x16xbf16>
    %34 = vector.shape_cast %33 : vector<1x32x16xbf16> to vector<32x16xbf16>
    %cst_23 = arith.constant dense<0.000000e+00> : vector<128x16xf32>
    %35 = tpu.matmul %32, %34, %cst_23 {dimension_numbers = #tpu.dot_dimension_numbers<[1], [0], [0], [1], [0, 0, 1, 1], [], []>} : vector<128x32xbf16>, vector<32x16xbf16>, vector<128x16xf32> -> vector<128x16xf32>
    %36 = arith.truncf %35 : vector<128x16xf32> to vector<128x16xbf16>
    %c0_24 = arith.constant 0 : index
    %c112 = arith.constant 112 : index
    %c0_25 = arith.constant 0 : index
    %37 = vector.load %arg2[%c0_24, %c112, %c0_25] : memref<4x128x32xbf16, #tpu.memory_space<vmem>>, vector<1x16x24xbf16>
    %38 = vector.shape_cast %37 : vector<1x16x24xbf16> to vector<16x24xbf16>
    %cst_26 = arith.constant dense<0.000000e+00> : vector<128x24xf32>
    %39 = tpu.matmul %36, %38, %cst_26 {dimension_numbers = #tpu.dot_dimension_numbers<[1], [0], [0], [1], [0, 0, 1, 1], [], []>} : vector<128x16xbf16>, vector<16x24xbf16>, vector<128x24xf32> -> vector<128x24xf32>
    %c0_27 = arith.constant 0 : index
    %c3 = arith.constant 3 : index
    %c0_28 = arith.constant 0 : index
    %40 = vector.load %arg3[%c0_27, %c3, %c0_28] : memref<4x4x32xf32, #tpu.memory_space<vmem>>, vector<1x1x24xf32>
    %41 = vector.shape_cast %40 : vector<1x1x24xf32> to vector<1x24xf32>
    %42 = vector.broadcast %41 : vector<1x24xf32> to vector<128x24xf32>
    %43 = arith.addf %39, %42 : vector<128x24xf32>
    %44 = vector.extract_strided_slice %43 {offsets = [0, 0], sizes = [128, 8], strides = [1, 1]} : vector<128x24xf32> to vector<128x8xf32>
    %45 = arith.addf %1, %44 : vector<128x8xf32>
    %46 = vector.extract_strided_slice %43 {offsets = [0, 8], sizes = [128, 16], strides = [1, 1]} : vector<128x24xf32> to vector<128x16xf32>
    %47 = arith.subf %0, %46 : vector<128x16xf32>
    %48 = arith.truncf %47 : vector<128x16xf32> to vector<128x16xbf16>
    %c1_29 = arith.constant 1 : index
    %c0_30 = arith.constant 0 : index
    %c0_31 = arith.constant 0 : index
    %49 = vector.load %arg2[%c1_29, %c0_30, %c0_31] : memref<4x128x32xbf16, #tpu.memory_space<vmem>>, vector<1x16x32xbf16>
    %50 = vector.shape_cast %49 : vector<1x16x32xbf16> to vector<16x32xbf16>
    %cst_32 = arith.constant dense<0.000000e+00> : vector<128x32xf32>
    %51 = tpu.matmul %48, %50, %cst_32 {dimension_numbers = #tpu.dot_dimension_numbers<[1], [0], [0], [1], [0, 0, 1, 1], [], []>} : vector<128x16xbf16>, vector<16x32xbf16>, vector<128x32xf32> -> vector<128x32xf32>
    %c1_33 = arith.constant 1 : index
    %c0_34 = arith.constant 0 : index
    %c0_35 = arith.constant 0 : index
    %52 = vector.load %arg3[%c1_33, %c0_34, %c0_35] : memref<4x4x32xf32, #tpu.memory_space<vmem>>, vector<1x1x32xf32>
    %53 = vector.shape_cast %52 : vector<1x1x32xf32> to vector<1x32xf32>
    %54 = vector.broadcast %53 : vector<1x32xf32> to vector<128x32xf32>
    %55 = arith.addf %51, %54 : vector<128x32xf32>
    %cst_36 = arith.constant 0.000000e+00 : f32
    %56 = vector.broadcast %cst_36 : f32 to vector<128x32xf32>
    %57 = arith.maximumf %55, %56 : vector<128x32xf32>
    %58 = arith.truncf %57 : vector<128x32xf32> to vector<128x32xbf16>
    %c1_37 = arith.constant 1 : index
    %c16_38 = arith.constant 16 : index
    %c0_39 = arith.constant 0 : index
    %59 = vector.load %arg2[%c1_37, %c16_38, %c0_39] : memref<4x128x32xbf16, #tpu.memory_space<vmem>>, vector<1x32x32xbf16>
    %60 = vector.shape_cast %59 : vector<1x32x32xbf16> to vector<32x32xbf16>
    %cst_40 = arith.constant dense<0.000000e+00> : vector<128x32xf32>
    %61 = tpu.matmul %58, %60, %cst_40 {dimension_numbers = #tpu.dot_dimension_numbers<[1], [0], [0], [1], [0, 0, 1, 1], [], []>} : vector<128x32xbf16>, vector<32x32xbf16>, vector<128x32xf32> -> vector<128x32xf32>
    %c1_41 = arith.constant 1 : index
    %c1_42 = arith.constant 1 : index
    %c0_43 = arith.constant 0 : index
    %62 = vector.load %arg3[%c1_41, %c1_42, %c0_43] : memref<4x4x32xf32, #tpu.memory_space<vmem>>, vector<1x1x32xf32>
    %63 = vector.shape_cast %62 : vector<1x1x32xf32> to vector<1x32xf32>
    %64 = vector.broadcast %63 : vector<1x32xf32> to vector<128x32xf32>
    %65 = arith.addf %61, %64 : vector<128x32xf32>
    %cst_44 = arith.constant 0.000000e+00 : f32
    %66 = vector.broadcast %cst_44 : f32 to vector<128x32xf32>
    %67 = arith.maximumf %65, %66 : vector<128x32xf32>
    %68 = arith.truncf %67 : vector<128x32xf32> to vector<128x32xbf16>
    %c1_45 = arith.constant 1 : index
    %c48_46 = arith.constant 48 : index
    %c0_47 = arith.constant 0 : index
    %69 = vector.load %arg2[%c1_45, %c48_46, %c0_47] : memref<4x128x32xbf16, #tpu.memory_space<vmem>>, vector<1x32x32xbf16>
    %70 = vector.shape_cast %69 : vector<1x32x32xbf16> to vector<32x32xbf16>
    %cst_48 = arith.constant dense<0.000000e+00> : vector<128x32xf32>
    %71 = tpu.matmul %68, %70, %cst_48 {dimension_numbers = #tpu.dot_dimension_numbers<[1], [0], [0], [1], [0, 0, 1, 1], [], []>} : vector<128x32xbf16>, vector<32x32xbf16>, vector<128x32xf32> -> vector<128x32xf32>
    %c1_49 = arith.constant 1 : index
    %c2_50 = arith.constant 2 : index
    %c0_51 = arith.constant 0 : index
    %72 = vector.load %arg3[%c1_49, %c2_50, %c0_51] : memref<4x4x32xf32, #tpu.memory_space<vmem>>, vector<1x1x32xf32>
    %73 = vector.shape_cast %72 : vector<1x1x32xf32> to vector<1x32xf32>
    %74 = vector.broadcast %73 : vector<1x32xf32> to vector<128x32xf32>
    %75 = arith.addf %71, %74 : vector<128x32xf32>
    %cst_52 = arith.constant 0.000000e+00 : f32
    %76 = vector.broadcast %cst_52 : f32 to vector<128x32xf32>
    %77 = arith.maximumf %75, %76 : vector<128x32xf32>
    %78 = arith.truncf %77 : vector<128x32xf32> to vector<128x32xbf16>
    %c1_53 = arith.constant 1 : index
    %c80_54 = arith.constant 80 : index
    %c0_55 = arith.constant 0 : index
    %79 = vector.load %arg2[%c1_53, %c80_54, %c0_55] : memref<4x128x32xbf16, #tpu.memory_space<vmem>>, vector<1x32x16xbf16>
    %80 = vector.shape_cast %79 : vector<1x32x16xbf16> to vector<32x16xbf16>
    %cst_56 = arith.constant dense<0.000000e+00> : vector<128x16xf32>
    %81 = tpu.matmul %78, %80, %cst_56 {dimension_numbers = #tpu.dot_dimension_numbers<[1], [0], [0], [1], [0, 0, 1, 1], [], []>} : vector<128x32xbf16>, vector<32x16xbf16>, vector<128x16xf32> -> vector<128x16xf32>
    %82 = arith.truncf %81 : vector<128x16xf32> to vector<128x16xbf16>
    %c1_57 = arith.constant 1 : index
    %c112_58 = arith.constant 112 : index
    %c0_59 = arith.constant 0 : index
    %83 = vector.load %arg2[%c1_57, %c112_58, %c0_59] : memref<4x128x32xbf16, #tpu.memory_space<vmem>>, vector<1x16x24xbf16>
    %84 = vector.shape_cast %83 : vector<1x16x24xbf16> to vector<16x24xbf16>
    %cst_60 = arith.constant dense<0.000000e+00> : vector<128x24xf32>
    %85 = tpu.matmul %82, %84, %cst_60 {dimension_numbers = #tpu.dot_dimension_numbers<[1], [0], [0], [1], [0, 0, 1, 1], [], []>} : vector<128x16xbf16>, vector<16x24xbf16>, vector<128x24xf32> -> vector<128x24xf32>
    %c1_61 = arith.constant 1 : index
    %c3_62 = arith.constant 3 : index
    %c0_63 = arith.constant 0 : index
    %86 = vector.load %arg3[%c1_61, %c3_62, %c0_63] : memref<4x4x32xf32, #tpu.memory_space<vmem>>, vector<1x1x24xf32>
    %87 = vector.shape_cast %86 : vector<1x1x24xf32> to vector<1x24xf32>
    %88 = vector.broadcast %87 : vector<1x24xf32> to vector<128x24xf32>
    %89 = arith.addf %85, %88 : vector<128x24xf32>
    %90 = vector.extract_strided_slice %89 {offsets = [0, 0], sizes = [128, 8], strides = [1, 1]} : vector<128x24xf32> to vector<128x8xf32>
    %91 = arith.addf %45, %90 : vector<128x8xf32>
    %92 = vector.extract_strided_slice %89 {offsets = [0, 8], sizes = [128, 16], strides = [1, 1]} : vector<128x24xf32> to vector<128x16xf32>
    %93 = arith.subf %47, %92 : vector<128x16xf32>
    %94 = arith.truncf %93 : vector<128x16xf32> to vector<128x16xbf16>
    %c2_64 = arith.constant 2 : index
    %c0_65 = arith.constant 0 : index
    %c0_66 = arith.constant 0 : index
    %95 = vector.load %arg2[%c2_64, %c0_65, %c0_66] : memref<4x128x32xbf16, #tpu.memory_space<vmem>>, vector<1x16x32xbf16>
    %96 = vector.shape_cast %95 : vector<1x16x32xbf16> to vector<16x32xbf16>
    %cst_67 = arith.constant dense<0.000000e+00> : vector<128x32xf32>
    %97 = tpu.matmul %94, %96, %cst_67 {dimension_numbers = #tpu.dot_dimension_numbers<[1], [0], [0], [1], [0, 0, 1, 1], [], []>} : vector<128x16xbf16>, vector<16x32xbf16>, vector<128x32xf32> -> vector<128x32xf32>
    %c2_68 = arith.constant 2 : index
    %c0_69 = arith.constant 0 : index
    %c0_70 = arith.constant 0 : index
    %98 = vector.load %arg3[%c2_68, %c0_69, %c0_70] : memref<4x4x32xf32, #tpu.memory_space<vmem>>, vector<1x1x32xf32>
    %99 = vector.shape_cast %98 : vector<1x1x32xf32> to vector<1x32xf32>
    %100 = vector.broadcast %99 : vector<1x32xf32> to vector<128x32xf32>
    %101 = arith.addf %97, %100 : vector<128x32xf32>
    %cst_71 = arith.constant 0.000000e+00 : f32
    %102 = vector.broadcast %cst_71 : f32 to vector<128x32xf32>
    %103 = arith.maximumf %101, %102 : vector<128x32xf32>
    %104 = arith.truncf %103 : vector<128x32xf32> to vector<128x32xbf16>
    %c2_72 = arith.constant 2 : index
    %c16_73 = arith.constant 16 : index
    %c0_74 = arith.constant 0 : index
    %105 = vector.load %arg2[%c2_72, %c16_73, %c0_74] : memref<4x128x32xbf16, #tpu.memory_space<vmem>>, vector<1x32x32xbf16>
    %106 = vector.shape_cast %105 : vector<1x32x32xbf16> to vector<32x32xbf16>
    %cst_75 = arith.constant dense<0.000000e+00> : vector<128x32xf32>
    %107 = tpu.matmul %104, %106, %cst_75 {dimension_numbers = #tpu.dot_dimension_numbers<[1], [0], [0], [1], [0, 0, 1, 1], [], []>} : vector<128x32xbf16>, vector<32x32xbf16>, vector<128x32xf32> -> vector<128x32xf32>
    %c2_76 = arith.constant 2 : index
    %c1_77 = arith.constant 1 : index
    %c0_78 = arith.constant 0 : index
    %108 = vector.load %arg3[%c2_76, %c1_77, %c0_78] : memref<4x4x32xf32, #tpu.memory_space<vmem>>, vector<1x1x32xf32>
    %109 = vector.shape_cast %108 : vector<1x1x32xf32> to vector<1x32xf32>
    %110 = vector.broadcast %109 : vector<1x32xf32> to vector<128x32xf32>
    %111 = arith.addf %107, %110 : vector<128x32xf32>
    %cst_79 = arith.constant 0.000000e+00 : f32
    %112 = vector.broadcast %cst_79 : f32 to vector<128x32xf32>
    %113 = arith.maximumf %111, %112 : vector<128x32xf32>
    %114 = arith.truncf %113 : vector<128x32xf32> to vector<128x32xbf16>
    %c2_80 = arith.constant 2 : index
    %c48_81 = arith.constant 48 : index
    %c0_82 = arith.constant 0 : index
    %115 = vector.load %arg2[%c2_80, %c48_81, %c0_82] : memref<4x128x32xbf16, #tpu.memory_space<vmem>>, vector<1x32x32xbf16>
    %116 = vector.shape_cast %115 : vector<1x32x32xbf16> to vector<32x32xbf16>
    %cst_83 = arith.constant dense<0.000000e+00> : vector<128x32xf32>
    %117 = tpu.matmul %114, %116, %cst_83 {dimension_numbers = #tpu.dot_dimension_numbers<[1], [0], [0], [1], [0, 0, 1, 1], [], []>} : vector<128x32xbf16>, vector<32x32xbf16>, vector<128x32xf32> -> vector<128x32xf32>
    %c2_84 = arith.constant 2 : index
    %c2_85 = arith.constant 2 : index
    %c0_86 = arith.constant 0 : index
    %118 = vector.load %arg3[%c2_84, %c2_85, %c0_86] : memref<4x4x32xf32, #tpu.memory_space<vmem>>, vector<1x1x32xf32>
    %119 = vector.shape_cast %118 : vector<1x1x32xf32> to vector<1x32xf32>
    %120 = vector.broadcast %119 : vector<1x32xf32> to vector<128x32xf32>
    %121 = arith.addf %117, %120 : vector<128x32xf32>
    %cst_87 = arith.constant 0.000000e+00 : f32
    %122 = vector.broadcast %cst_87 : f32 to vector<128x32xf32>
    %123 = arith.maximumf %121, %122 : vector<128x32xf32>
    %124 = arith.truncf %123 : vector<128x32xf32> to vector<128x32xbf16>
    %c2_88 = arith.constant 2 : index
    %c80_89 = arith.constant 80 : index
    %c0_90 = arith.constant 0 : index
    %125 = vector.load %arg2[%c2_88, %c80_89, %c0_90] : memref<4x128x32xbf16, #tpu.memory_space<vmem>>, vector<1x32x16xbf16>
    %126 = vector.shape_cast %125 : vector<1x32x16xbf16> to vector<32x16xbf16>
    %cst_91 = arith.constant dense<0.000000e+00> : vector<128x16xf32>
    %127 = tpu.matmul %124, %126, %cst_91 {dimension_numbers = #tpu.dot_dimension_numbers<[1], [0], [0], [1], [0, 0, 1, 1], [], []>} : vector<128x32xbf16>, vector<32x16xbf16>, vector<128x16xf32> -> vector<128x16xf32>
    %128 = arith.truncf %127 : vector<128x16xf32> to vector<128x16xbf16>
    %c2_92 = arith.constant 2 : index
    %c112_93 = arith.constant 112 : index
    %c0_94 = arith.constant 0 : index
    %129 = vector.load %arg2[%c2_92, %c112_93, %c0_94] : memref<4x128x32xbf16, #tpu.memory_space<vmem>>, vector<1x16x24xbf16>
    %130 = vector.shape_cast %129 : vector<1x16x24xbf16> to vector<16x24xbf16>
    %cst_95 = arith.constant dense<0.000000e+00> : vector<128x24xf32>
    %131 = tpu.matmul %128, %130, %cst_95 {dimension_numbers = #tpu.dot_dimension_numbers<[1], [0], [0], [1], [0, 0, 1, 1], [], []>} : vector<128x16xbf16>, vector<16x24xbf16>, vector<128x24xf32> -> vector<128x24xf32>
    %c2_96 = arith.constant 2 : index
    %c3_97 = arith.constant 3 : index
    %c0_98 = arith.constant 0 : index
    %132 = vector.load %arg3[%c2_96, %c3_97, %c0_98] : memref<4x4x32xf32, #tpu.memory_space<vmem>>, vector<1x1x24xf32>
    %133 = vector.shape_cast %132 : vector<1x1x24xf32> to vector<1x24xf32>
    %134 = vector.broadcast %133 : vector<1x24xf32> to vector<128x24xf32>
    %135 = arith.addf %131, %134 : vector<128x24xf32>
    %136 = vector.extract_strided_slice %135 {offsets = [0, 0], sizes = [128, 8], strides = [1, 1]} : vector<128x24xf32> to vector<128x8xf32>
    %137 = arith.addf %91, %136 : vector<128x8xf32>
    %138 = vector.extract_strided_slice %135 {offsets = [0, 8], sizes = [128, 16], strides = [1, 1]} : vector<128x24xf32> to vector<128x16xf32>
    %139 = arith.subf %93, %138 : vector<128x16xf32>
    %140 = arith.truncf %139 : vector<128x16xf32> to vector<128x16xbf16>
    %c3_99 = arith.constant 3 : index
    %c0_100 = arith.constant 0 : index
    %c0_101 = arith.constant 0 : index
    %141 = vector.load %arg2[%c3_99, %c0_100, %c0_101] : memref<4x128x32xbf16, #tpu.memory_space<vmem>>, vector<1x16x32xbf16>
    %142 = vector.shape_cast %141 : vector<1x16x32xbf16> to vector<16x32xbf16>
    %cst_102 = arith.constant dense<0.000000e+00> : vector<128x32xf32>
    %143 = tpu.matmul %140, %142, %cst_102 {dimension_numbers = #tpu.dot_dimension_numbers<[1], [0], [0], [1], [0, 0, 1, 1], [], []>} : vector<128x16xbf16>, vector<16x32xbf16>, vector<128x32xf32> -> vector<128x32xf32>
    %c3_103 = arith.constant 3 : index
    %c0_104 = arith.constant 0 : index
    %c0_105 = arith.constant 0 : index
    %144 = vector.load %arg3[%c3_103, %c0_104, %c0_105] : memref<4x4x32xf32, #tpu.memory_space<vmem>>, vector<1x1x32xf32>
    %145 = vector.shape_cast %144 : vector<1x1x32xf32> to vector<1x32xf32>
    %146 = vector.broadcast %145 : vector<1x32xf32> to vector<128x32xf32>
    %147 = arith.addf %143, %146 : vector<128x32xf32>
    %cst_106 = arith.constant 0.000000e+00 : f32
    %148 = vector.broadcast %cst_106 : f32 to vector<128x32xf32>
    %149 = arith.maximumf %147, %148 : vector<128x32xf32>
    %150 = arith.truncf %149 : vector<128x32xf32> to vector<128x32xbf16>
    %c3_107 = arith.constant 3 : index
    %c16_108 = arith.constant 16 : index
    %c0_109 = arith.constant 0 : index
    %151 = vector.load %arg2[%c3_107, %c16_108, %c0_109] : memref<4x128x32xbf16, #tpu.memory_space<vmem>>, vector<1x32x32xbf16>
    %152 = vector.shape_cast %151 : vector<1x32x32xbf16> to vector<32x32xbf16>
    %cst_110 = arith.constant dense<0.000000e+00> : vector<128x32xf32>
    %153 = tpu.matmul %150, %152, %cst_110 {dimension_numbers = #tpu.dot_dimension_numbers<[1], [0], [0], [1], [0, 0, 1, 1], [], []>} : vector<128x32xbf16>, vector<32x32xbf16>, vector<128x32xf32> -> vector<128x32xf32>
    %c3_111 = arith.constant 3 : index
    %c1_112 = arith.constant 1 : index
    %c0_113 = arith.constant 0 : index
    %154 = vector.load %arg3[%c3_111, %c1_112, %c0_113] : memref<4x4x32xf32, #tpu.memory_space<vmem>>, vector<1x1x32xf32>
    %155 = vector.shape_cast %154 : vector<1x1x32xf32> to vector<1x32xf32>
    %156 = vector.broadcast %155 : vector<1x32xf32> to vector<128x32xf32>
    %157 = arith.addf %153, %156 : vector<128x32xf32>
    %cst_114 = arith.constant 0.000000e+00 : f32
    %158 = vector.broadcast %cst_114 : f32 to vector<128x32xf32>
    %159 = arith.maximumf %157, %158 : vector<128x32xf32>
    %160 = arith.truncf %159 : vector<128x32xf32> to vector<128x32xbf16>
    %c3_115 = arith.constant 3 : index
    %c48_116 = arith.constant 48 : index
    %c0_117 = arith.constant 0 : index
    %161 = vector.load %arg2[%c3_115, %c48_116, %c0_117] : memref<4x128x32xbf16, #tpu.memory_space<vmem>>, vector<1x32x32xbf16>
    %162 = vector.shape_cast %161 : vector<1x32x32xbf16> to vector<32x32xbf16>
    %cst_118 = arith.constant dense<0.000000e+00> : vector<128x32xf32>
    %163 = tpu.matmul %160, %162, %cst_118 {dimension_numbers = #tpu.dot_dimension_numbers<[1], [0], [0], [1], [0, 0, 1, 1], [], []>} : vector<128x32xbf16>, vector<32x32xbf16>, vector<128x32xf32> -> vector<128x32xf32>
    %c3_119 = arith.constant 3 : index
    %c2_120 = arith.constant 2 : index
    %c0_121 = arith.constant 0 : index
    %164 = vector.load %arg3[%c3_119, %c2_120, %c0_121] : memref<4x4x32xf32, #tpu.memory_space<vmem>>, vector<1x1x32xf32>
    %165 = vector.shape_cast %164 : vector<1x1x32xf32> to vector<1x32xf32>
    %166 = vector.broadcast %165 : vector<1x32xf32> to vector<128x32xf32>
    %167 = arith.addf %163, %166 : vector<128x32xf32>
    %cst_122 = arith.constant 0.000000e+00 : f32
    %168 = vector.broadcast %cst_122 : f32 to vector<128x32xf32>
    %169 = arith.maximumf %167, %168 : vector<128x32xf32>
    %170 = arith.truncf %169 : vector<128x32xf32> to vector<128x32xbf16>
    %c3_123 = arith.constant 3 : index
    %c80_124 = arith.constant 80 : index
    %c0_125 = arith.constant 0 : index
    %171 = vector.load %arg2[%c3_123, %c80_124, %c0_125] : memref<4x128x32xbf16, #tpu.memory_space<vmem>>, vector<1x32x16xbf16>
    %172 = vector.shape_cast %171 : vector<1x32x16xbf16> to vector<32x16xbf16>
    %cst_126 = arith.constant dense<0.000000e+00> : vector<128x16xf32>
    %173 = tpu.matmul %170, %172, %cst_126 {dimension_numbers = #tpu.dot_dimension_numbers<[1], [0], [0], [1], [0, 0, 1, 1], [], []>} : vector<128x32xbf16>, vector<32x16xbf16>, vector<128x16xf32> -> vector<128x16xf32>
    %174 = arith.truncf %173 : vector<128x16xf32> to vector<128x16xbf16>
    %c3_127 = arith.constant 3 : index
    %c112_128 = arith.constant 112 : index
    %c0_129 = arith.constant 0 : index
    %175 = vector.load %arg2[%c3_127, %c112_128, %c0_129] : memref<4x128x32xbf16, #tpu.memory_space<vmem>>, vector<1x16x24xbf16>
    %176 = vector.shape_cast %175 : vector<1x16x24xbf16> to vector<16x24xbf16>
    %cst_130 = arith.constant dense<0.000000e+00> : vector<128x24xf32>
    %177 = tpu.matmul %174, %176, %cst_130 {dimension_numbers = #tpu.dot_dimension_numbers<[1], [0], [0], [1], [0, 0, 1, 1], [], []>} : vector<128x16xbf16>, vector<16x24xbf16>, vector<128x24xf32> -> vector<128x24xf32>
    %c3_131 = arith.constant 3 : index
    %c3_132 = arith.constant 3 : index
    %c0_133 = arith.constant 0 : index
    %178 = vector.load %arg3[%c3_131, %c3_132, %c0_133] : memref<4x4x32xf32, #tpu.memory_space<vmem>>, vector<1x1x24xf32>
    %179 = vector.shape_cast %178 : vector<1x1x24xf32> to vector<1x24xf32>
    %180 = vector.broadcast %179 : vector<1x24xf32> to vector<128x24xf32>
    %181 = arith.addf %177, %180 : vector<128x24xf32>
    %182 = vector.extract_strided_slice %181 {offsets = [0, 0], sizes = [128, 8], strides = [1, 1]} : vector<128x24xf32> to vector<128x8xf32>
    %183 = arith.addf %137, %182 : vector<128x8xf32>
    %184 = vector.extract_strided_slice %181 {offsets = [0, 8], sizes = [128, 16], strides = [1, 1]} : vector<128x24xf32> to vector<128x16xf32>
    %185 = arith.subf %139, %184 : vector<128x16xf32>
    %c0_134 = arith.constant 0 : index
    %c0_135 = arith.constant 0 : index
    %186 = vector.load %arg4[%c0_134, %c0_135] : memref<128x24xf32, #tpu.memory_space<vmem>>, vector<128x8xf32>
    tpu.vector_store %arg4[%c0_134, %c0_135], %183 {strides = array<i32>} : memref<128x24xf32, #tpu.memory_space<vmem>>, vector<128x8xf32>,
    %c0_136 = arith.constant 0 : index
    %c8 = arith.constant 8 : index
    %187 = vector.load %arg4[%c0_136, %c8] : memref<128x24xf32, #tpu.memory_space<vmem>>, vector<128x16xf32>
    tpu.vector_store %arg4[%c0_136, %c8], %185 {strides = array<i32>} : memref<128x24xf32, #tpu.memory_space<vmem>>, vector<128x16xf32>,
    return
  }
  func.func @transform_0(%arg0: i32) -> (i32, i32) {
    %c0_i32 = arith.constant 0 : i32
    %c0_i32_0 = arith.constant 0 : i32
    return %arg0, %c0_i32 : i32, i32
  }
  func.func @transform_1(%arg0: i32) -> (i32, i32, i32) {
    %c0_i32 = arith.constant 0 : i32
    %c0_i32_0 = arith.constant 0 : i32
    %c0_i32_1 = arith.constant 0 : i32
    %c0_i32_2 = arith.constant 0 : i32
    return %c0_i32, %c0_i32_0, %c0_i32_1 : i32, i32, i32
  }
  func.func @transform_2(%arg0: i32) -> (i32, i32, i32) {
    %c0_i32 = arith.constant 0 : i32
    %c0_i32_0 = arith.constant 0 : i32
    %c0_i32_1 = arith.constant 0 : i32
    %c0_i32_2 = arith.constant 0 : i32
    return %c0_i32, %c0_i32_0, %c0_i32_1 : i32, i32, i32
  }
  func.func @transform_3(%arg0: i32) -> (i32, i32) {
    %c0_i32 = arith.constant 0 : i32
    %c0_i32_0 = arith.constant 0 : i32
    return %arg0, %c0_i32 : i32, i32
  }
}

</mosaic_0001>

<bundles_post_ra>
// kernel: tpu_custom_call.1
= control target key start
LH: loop header
LB: loop body
LE: loop exit
PB: predicated region body
PF: predicated region fallthrough
CT: control target
= control target key end

     0   :  { %s4772_s12 = smov 0   ;;  %s5732_s0 = inlined_call_operand.vmem [shape: f32[256,16], index: 0, kind: input, shape index: {}]   ;;  %s5733_s1 = inlined_call_operand.vmem [shape: bf16[4,128,32], index: 1, kind: input, shape index: {}]   ;;  %s5734_s2 = inlined_call_operand.vmem [shape: f32[4,4,32], index: 2, kind: input, shape index: {}]   ;;  %s5735_s3 = inlined_call_operand.vmem [shape: f32[256,24], index: 3, kind: output, shape index: {}]  }
   0x1 LB: > { %s3845_s13 = sadd.s32 4294967295, %s4748_s12   ;;  %p3849_p0 = scmp.ge.s32.totalorder %s4748_s12, 1  ;;  %s4748_s12 = sphi %s4772_s12, %s13_s12  }
   0x2   : > { %p138_p1 = scmp.lt.s32.totalorder %s4748_s12, 3 }
   0x4   : > { %p139_p2 = pnand %p3849_p0, %p138_p1 }
   0x6   : > { %142 = sbr.rel (%p139_p2) target bundleno = 5057 (0x13c1), region = 32 }
   0xd   : > { %v4710_v0 = vld [vmem:[%s5733_s1] sm:$0xff]   ;;  %s3850_s16 = sshll.u32 %s3845_s13, 4  ;;  %vm212_vm0 = vcmask 130048   ;;  %v4711_v25 = vld [vmem:[%s5733_s1 + $0x8] sm:$0xff]   ;;  %v4712_v26 = vld [vmem:[%s5733_s1 + $0x10] sm:$0xff]   ;;  %vm379_vm1 = vcmask 261120  }
   0xe   : > { %p163_p3 = scmp.lt.s32.totalorder %s3850_s16, 31  ;;  %4316 = vmatprep.subr.bf16.mxu0 %v4710_v0  ;;  %4334 = vmatprep.subr.bf16.mxu1 %v4711_v25  ;;  %v4713_v27 = vld [vmem:[%s5733_s1 + $0x18] sm:$0xff]   ;;  %v4714_v28 = vld [vmem:[%s5733_s1 + $0x20] sm:$0xff]   ;;  %s4750_s21 = smov 120   ;;  %vm3691_vm2 = vcmask 64512   ;;  %vm3772_vm3 = vcmask 195648  }
   0xf   : > { %4317 = vmatpush3.bf16.msra.mxu0 %v4710_v0  ;;  %4335 = vmatpush3.bf16.msra.mxu1 %v4711_v25  ;;  %v3854_v29 = vld [vmem:[%s5734_s2] ss:$0 sm:$0xff] }
  0x10   : > { %s5752_s16 = smov (!%p163_p3, %s3850_s16), 31  ;;  %4336 = vmatprep.subr.bf16.mxu1 %v4712_v26  ;;  %4354 = vmatprep.subr.bf16.mxu0 %v4713_v27 }
  0x11   : > { %s3851_s17 = sshll.u32 %s5752_s16, 3  ;;  %s4751_s16 = smov 8  }
  0x12   : > { %s4791_s20 = scalar_lea.vmem %s5732_s0, %s3851_s17  ;;  %s5584_s25 = scalar_lea.vmem %s5735_s3, %s3851_s17 }
  0x13   : > { %v4794_v1 = vld [vmem:[%s4791_s20] sm:$0xff]  ;;  %v4797_v2 = vld [vmem:[%s4791_s20 + $0x8] sm:$0xff]  ;;  %v4800_v3 = vld [vmem:[%s4791_s20 + $0x10] sm:$0xff]  ;;  %4337 = vmatpush3.bf16.msra.mxu1 %v4712_v26 }
  0x14   : > { %v191_v4 = vpack.c.bf16 %v4797_v2, %v4794_v1  ;;  %v4805_v5 = vld [vmem:[%s4791_s20 + $0x18] sm:$0xff]  ;;  %v4808_v6 = vld [vmem:[%s4791_s20 + $0x20] sm:$0xff]  ;;  %v4811_v7 = vld [vmem:[%s4791_s20 + $0x28] sm:$0xff] }
  0x15   : > { %v192_v8 = vpack.c.bf16 %v4805_v5, %v4800_v3  ;;  %v193_v9 = vpack.c.bf16 %v4811_v7, %v4808_v6  ;;  %v4820_v10 = vld [vmem:[%s4791_s20 + $0x30] sm:$0xff]  ;;  %v4823_v11 = vld [vmem:[%s4791_s20 + $0x38] sm:$0xff]  ;;  %v4826_v12 = vld [vmem:[%s4791_s20 + $0x40] sm:$0xff] }
  0x16   : > { %4318 = vmatprep.mubr.msk.bf16.mxu0 %vm212_vm0, %v191_v4  ;;  %v4830_v13 = vld [vmem:[%s4791_s20 + $0x48] sm:$0xff]  ;;  %v194_v14 = vpack.c.bf16 %v4823_v11, %v4820_v10  ;;  %v4837_v16 = vld [vmem:[%s4791_s20 + $0x50] sm:$0xff]  ;;  %v4840_v17 = vld [vmem:[%s4791_s20 + $0x58] sm:$0xff] }
  0x17   : > { %4319 = vmatmul.mubr.msk.bf16.vlgmr.msra.gmra.mrb[0].mxu0 %vm212_vm0, %v192_v8  ;;  %v195_v15 = vpack.c.bf16 %v4830_v13, %v4826_v12  ;;  %v4844_v18 = vld [vmem:[%s4791_s20 + $0x60] sm:$0xff]  ;;  %v4847_v19 = vld [vmem:[%s4791_s20 + $0x68] sm:$0xff]  ;;  %v196_v20 = vpack.c.bf16 %v4840_v17, %v4837_v16  ;;  %v4857_v22 = vld [vmem:[%s4791_s20 + $0x70] sm:$0xff] }
  0x18   : > { %4322 = vmatprep.mubr.msk.bf16.mxu0 %vm212_vm0, %v193_v9  ;;  %v197_v21 = vpack.c.bf16 %v4847_v19, %v4844_v18  ;;  %v4860_v23 = vld [vmem:[%s4791_s20 + $0x78] sm:$0xff]  ;;  %4355 = vmatpush3.bf16.msra.mxu0 %v4713_v27 }
  0x19   : > { %v198_v24 = vpack.c.bf16 %v4860_v23, %v4857_v22  ;;  %4356 = vmatprep.subr.bf16.mxu0 %v4714_v28 }
  0x1c   : > { %4357 = vmatpush3.bf16.msra.mxu0 %v4714_v28 }
  0x1f   : > { %4323 = vmatmul.mubr.msk.bf16.gmra.mrb[4].mxu0 %vm212_vm0, %v194_v14 }
  0x20   : > { %4326 = vmatprep.mubr.msk.bf16.mxu0 %vm212_vm0, %v195_v15 }
  0x27   : > { %4327 = vmatmul.mubr.msk.bf16.gmra.mrb[8].mxu0 %vm212_vm0, %v196_v20 }
  0x28   : > { %4330 = vmatprep.mubr.msk.bf16.mxu0 %vm212_vm0, %v197_v21 }
  0x2f   : > { %4331 = vmatmul.mubr.msk.bf16.gmra.mrb[12].mxu0 %vm212_vm0, %v198_v24 }
  0xea   : > { %v4320_v30 = vpop.f32.mrb[0].mxu0 }
  0xeb   : > { %v280_v31 = vadd.f32 %v4320_v30, %v3854_v29  ;;  %v271_v32 = vpop.f32.mrb[1].mxu0 }
  0xec   : > { %v272_v33 = vadd.f32 %v3854_v29, %v271_v32  ;;  %v4321_v34 = vpop.f32.mrb[2].mxu0 }
  0xed   : > { %v283_v35 = vadd.f32 %v4321_v34, %v3854_v29  ;;  %v274_v36 = vpop.f32.mrb[3].mxu0  ;;  %v336_v38 = vmax.f32 %v280_v31, 0.0 }
  0xee   : > { %v275_v37 = vadd.f32 %v3854_v29, %v274_v36  ;;  %v334_v40 = vmax.f32 %v272_v33, 0.0 }
  0xef   : > { %v337_v39 = vmax.f32 %v283_v35, 0.0 }
  0xf0   : > { %v335_v41 = vmax.f32 %v275_v37, 0.0 }
  0xf1   : > { %v351_v42 = vpack.c.bf16 %v337_v39, %v336_v38  ;;  %v4715_v39 = vld [vmem:[%s5733_s1 + $0x28] sm:$0xff]  }
  0xf2   : > { %v4324_v43 = vpop.f32.mrb[4].mxu0  ;;  %v350_v44 = vpack.c.bf16 %v335_v41, %v334_v40  ;;  %v4716_v40 = vld [vmem:[%s5733_s1 + $0x30] sm:$0xff]   ;;  %4374 = vmatprep.subr.bf16.mxu1 %v4715_v39 }
  0xf3   : > { %v296_v45 = vadd.f32 %v4324_v43, %v3854_v29  ;;  %v287_v46 = vpop.f32.mrb[5].mxu0 }
  0xf4   : > { %v288_v47 = vadd.f32 %v3854_v29, %v287_v46  ;;  %v4325_v48 = vpop.f32.mrb[6].mxu0  ;;  %4338 = vmatprep.mubr.msk.bf16.mxu1 %vm379_vm1, %v350_v44 }
  0xf5   : > { %v299_v49 = vadd.f32 %v4325_v48, %v3854_v29  ;;  %v290_v50 = vpop.f32.mrb[7].mxu0  ;;  %4339 = vmatmul.mubr.msk.bf16.vlgmr.msra.gmra.mrb[0].mxu1 %vm379_vm1, %v351_v42  ;;  %v340_v52 = vmax.f32 %v296_v45, 0.0 }
  0xf6   : > { %v291_v51 = vadd.f32 %v3854_v29, %v290_v50  ;;  %v338_v54 = vmax.f32 %v288_v47, 0.0  ;;  %4375 = vmatpush3.bf16.msra.mxu1 %v4715_v39 }
  0xf7   : > { %v341_v53 = vmax.f32 %v299_v49, 0.0  ;;  %4376 = vmatprep.subr.bf16.mxu1 %v4716_v40 }
  0xf8   : > { %v339_v55 = vmax.f32 %v291_v51, 0.0 }
  0xf9   : > { %v353_v56 = vpack.c.bf16 %v341_v53, %v340_v52 }
  0xfa   : > { %v352_v57 = vpack.c.bf16 %v339_v55, %v338_v54  ;;  %v4328_v58 = vpop.f32.mrb[8].mxu0  ;;  %4377 = vmatpush3.bf16.msra.mxu1 %v4716_v40 }
  0xfb   : > { %v312_v59 = vadd.f32 %v4328_v58, %v3854_v29  ;;  %v303_v60 = vpop.f32.mrb[9].mxu0 }
  0xfc   : > { %v304_v61 = vadd.f32 %v3854_v29, %v303_v60  ;;  %v4329_v62 = vpop.f32.mrb[10].mxu0  ;;  %4342 = vmatprep.mubr.msk.bf16.mxu1 %vm379_vm1, %v352_v57 }
  0xfd   : > { %v315_v63 = vadd.f32 %v4329_v62, %v3854_v29  ;;  %v306_v0 = vpop.f32.mrb[11].mxu0  ;;  %4343 = vmatmul.mubr.msk.bf16.gmra.mrb[4].mxu1 %vm379_vm1, %v353_v56  ;;  %v344_v8 = vmax.f32 %v312_v59, 0.0 }
  0xfe   : > { %v307_v4 = vadd.f32 %v3854_v29, %v306_v0  ;;  %v342_v14 = vmax.f32 %v304_v61, 0.0 }
  0xff   : > { %v345_v9 = vmax.f32 %v315_v63, 0.0 }
 0x100   : > { %v343_v15 = vmax.f32 %v307_v4, 0.0 }
 0x101   : > { %v355_v20 = vpack.c.bf16 %v345_v9, %v344_v8 }
 0x102   : > { %v354_v21 = vpack.c.bf16 %v343_v15, %v342_v14  ;;  %v4332_v24 = vpop.f32.mrb[12].mxu0 }
 0x103   : > { %v328_v25 = vadd.f32 %v4332_v24, %v3854_v29  ;;  %v319_v26 = vpop.f32.mrb[13].mxu0 }
 0x104   : > { %v320_v27 = vadd.f32 %v3854_v29, %v319_v26  ;;  %v4333_v28 = vpop.f32.mrb[14].mxu0  ;;  %4346 = vmatprep.mubr.msk.bf16.mxu1 %vm379_vm1, %v354_v21 }
 0x105   : > { %v331_v30 = vadd.f32 %v4333_v28, %v3854_v29  ;;  %v322_v31 = vpop.f32.mrb[15].mxu0  ;;  %4347 = vmatmul.mubr.msk.bf16.gmra.mrb[8].mxu1 %vm379_vm1, %v355_v20  ;;  %v348_v33 = vmax.f32 %v328_v25, 0.0 }
 0x106   : > { %v323_v32 = vadd.f32 %v3854_v29, %v322_v31  ;;  %v346_v35 = vmax.f32 %v320_v27, 0.0  ;;  %v3864_v29 = vld [vmem:[%s5734_s2 + $0x1] ss:$0 sm:$0xff] }
 0x107   : > { %v349_v34 = vmax.f32 %v331_v30, 0.0 }
 0x108   : > { %v347_v36 = vmax.f32 %v323_v32, 0.0 }
 0x109   : > { %v357_v37 = vpack.c.bf16 %v349_v34, %v348_v33 }
 0x10a   : > { %v356_v38 = vpack.c.bf16 %v347_v36, %v346_v35 }
 0x10c   : > { %4350 = vmatprep.mubr.msk.bf16.mxu1 %vm379_vm1, %v356_v38 }
 0x10d   : > { %4351 = vmatmul.mubr.msk.bf16.gmra.mrb[12].mxu1 %vm379_vm1, %v357_v37 }
 0x1c8   : > { %v4340_v41 = vpop.f32.mrb[0].mxu1 }
 0x1c9   : > { %v447_v42 = vadd.f32 %v4340_v41, %v3864_v29  ;;  %v438_v43 = vpop.f32.mrb[1].mxu1 }
 0x1ca   : > { %v439_v44 = vadd.f32 %v3864_v29, %v438_v43  ;;  %v4341_v45 = vpop.f32.mrb[2].mxu1 }
 0x1cb   : > { %v450_v46 = vadd.f32 %v4341_v45, %v3864_v29  ;;  %v441_v47 = vpop.f32.mrb[3].mxu1  ;;  %v503_v49 = vmax.f32 %v447_v42, 0.0 }
 0x1cc   : > { %v442_v48 = vadd.f32 %v3864_v29, %v441_v47  ;;  %v501_v51 = vmax.f32 %v439_v44, 0.0 }
 0x1cd   : > { %v504_v50 = vmax.f32 %v450_v46, 0.0 }
 0x1ce   : > { %v502_v52 = vmax.f32 %v442_v48, 0.0 }
 0x1cf   : > { %v518_v53 = vpack.c.bf16 %v504_v50, %v503_v49  ;;  %v4717_v50 = vld [vmem:[%s5733_s1 + $0x38] sm:$0xff]  }
 0x1d0   : > { %v517_v54 = vpack.c.bf16 %v502_v52, %v501_v51  ;;  %v4344_v55 = vpop.f32.mrb[4].mxu1  ;;  %4394 = vmatprep.subr.bf16.mxu0 %v4717_v50 }
 0x1d1   : > { %v463_v56 = vadd.f32 %v4344_v55, %v3864_v29  ;;  %v454_v57 = vpop.f32.mrb[5].mxu1 }
 0x1d2   : > { %v455_v58 = vadd.f32 %v3864_v29, %v454_v57  ;;  %v4345_v59 = vpop.f32.mrb[6].mxu1  ;;  %4358 = vmatprep.mubr.msk.bf16.mxu0 %vm379_vm1, %v517_v54 }
 0x1d3   : > { %v466_v60 = vadd.f32 %v4345_v59, %v3864_v29  ;;  %v457_v61 = vpop.f32.mrb[7].mxu1  ;;  %4359 = vmatmul.mubr.msk.bf16.vlgmr.msra.gmra.mrb[16].mxu0 %vm379_vm1, %v518_v53  ;;  %v507_v63 = vmax.f32 %v463_v56, 0.0 }
 0x1d4   : > { %v458_v62 = vadd.f32 %v3864_v29, %v457_v61  ;;  %v505_v4 = vmax.f32 %v455_v58, 0.0  ;;  %4395 = vmatpush3.bf16.msra.mxu0 %v4717_v50 }
 0x1d5   : > { %v508_v0 = vmax.f32 %v466_v60, 0.0 }
 0x1d6   : > { %v506_v8 = vmax.f32 %v458_v62, 0.0 }
 0x1d7   : > { %v520_v9 = vpack.c.bf16 %v508_v0, %v507_v63 }
 0x1d8   : > { %v519_v14 = vpack.c.bf16 %v506_v8, %v505_v4  ;;  %v4348_v15 = vpop.f32.mrb[8].mxu1 }
 0x1d9   : > { %v479_v20 = vadd.f32 %v4348_v15, %v3864_v29  ;;  %v470_v21 = vpop.f32.mrb[9].mxu1 }
 0x1da   : > { %v471_v24 = vadd.f32 %v3864_v29, %v470_v21  ;;  %v4349_v25 = vpop.f32.mrb[10].mxu1  ;;  %4362 = vmatprep.mubr.msk.bf16.mxu0 %vm379_vm1, %v519_v14 }
 0x1db   : > { %v482_v26 = vadd.f32 %v4349_v25, %v3864_v29  ;;  %v473_v27 = vpop.f32.mrb[11].mxu1  ;;  %4363 = vmatmul.mubr.msk.bf16.gmra.mrb[20].mxu0 %vm379_vm1, %v520_v9  ;;  %v511_v30 = vmax.f32 %v479_v20, 0.0 }
 0x1dc   : > { %v474_v28 = vadd.f32 %v3864_v29, %v473_v27  ;;  %v509_v32 = vmax.f32 %v471_v24, 0.0 }
 0x1dd   : > { %v512_v31 = vmax.f32 %v482_v26, 0.0 }
 0x1de   : > { %v510_v33 = vmax.f32 %v474_v28, 0.0 }
 0x1df   : > { %v522_v34 = vpack.c.bf16 %v512_v31, %v511_v30 }
 0x1e0   : > { %v521_v35 = vpack.c.bf16 %v510_v33, %v509_v32  ;;  %v4352_v36 = vpop.f32.mrb[12].mxu1 }
 0x1e1   : > { %v495_v37 = vadd.f32 %v4352_v36, %v3864_v29  ;;  %v486_v38 = vpop.f32.mrb[13].mxu1 }
 0x1e2   : > { %v487_v39 = vadd.f32 %v3864_v29, %v486_v38  ;;  %v4353_v40 = vpop.f32.mrb[14].mxu1  ;;  %4366 = vmatprep.mubr.msk.bf16.mxu0 %vm379_vm1, %v521_v35 }
 0x1e3   : > { %v498_v41 = vadd.f32 %v4353_v40, %v3864_v29  ;;  %v489_v42 = vpop.f32.mrb[15].mxu1  ;;  %4367 = vmatmul.mubr.msk.bf16.gmra.mrb[24].mxu0 %vm379_vm1, %v522_v34  ;;  %v515_v44 = vmax.f32 %v495_v37, 0.0 }
 0x1e4   : > { %v490_v43 = vadd.f32 %v3864_v29, %v489_v42  ;;  %v513_v46 = vmax.f32 %v487_v39, 0.0  ;;  %v3875_v29 = vld [vmem:[%s5734_s2 + $0x2] ss:$0 sm:$0xff] }
 0x1e5   : > { %v516_v45 = vmax.f32 %v498_v41, 0.0 }
 0x1e6   : > { %v514_v47 = vmax.f32 %v490_v43, 0.0 }
 0x1e7   : > { %v524_v48 = vpack.c.bf16 %v516_v45, %v515_v44 }
 0x1e8   : > { %v523_v49 = vpack.c.bf16 %v514_v47, %v513_v46 }
 0x1ea   : > { %4370 = vmatprep.mubr.msk.bf16.mxu0 %vm379_vm1, %v523_v49 }
 0x1eb   : > { %4371 = vmatmul.mubr.msk.bf16.gmra.mrb[28].mxu0 %vm379_vm1, %v524_v48 }
 0x2a6   : > { %v4360_v51 = vpop.f32.mrb[16].mxu0 }
 0x2a7   : > { %v613_v52 = vadd.f32 %v4360_v51, %v3875_v29  ;;  %v604_v53 = vpop.f32.mrb[17].mxu0 }
 0x2a8   : > { %v605_v54 = vadd.f32 %v3875_v29, %v604_v53  ;;  %v4361_v55 = vpop.f32.mrb[18].mxu0 }
 0x2a9   : > { %v616_v56 = vadd.f32 %v4361_v55, %v3875_v29  ;;  %v607_v57 = vpop.f32.mrb[19].mxu0  ;;  %v669_v59 = vmax.f32 %v613_v52, 0.0 }
 0x2aa   : > { %v608_v58 = vadd.f32 %v3875_v29, %v607_v57  ;;  %v667_v61 = vmax.f32 %v605_v54, 0.0 }
 0x2ab   : > { %v670_v60 = vmax.f32 %v616_v56, 0.0 }
 0x2ac   : > { %v668_v62 = vmax.f32 %v608_v58, 0.0 }
 0x2ad   : > { %v684_v63 = vpack.c.bf16 %v670_v60, %v669_v59 }
 0x2ae   : > { %v683_v0 = vpack.c.bf16 %v668_v62, %v667_v61  ;;  %v4364_v4 = vpop.f32.mrb[20].mxu0 }
 0x2af   : > { %v629_v8 = vadd.f32 %v4364_v4, %v3875_v29  ;;  %v620_v9 = vpop.f32.mrb[21].mxu0 }
 0x2b0   : > { %v621_v14 = vadd.f32 %v3875_v29, %v620_v9  ;;  %v4365_v15 = vpop.f32.mrb[22].mxu0  ;;  %4378 = vmatprep.mubr.msk.bf16.mxu1 %vm379_vm1, %v683_v0 }
 0x2b1   : > { %v632_v20 = vadd.f32 %v4365_v15, %v3875_v29  ;;  %v623_v21 = vpop.f32.mrb[23].mxu0  ;;  %4379 = vmatmul.mubr.msk.bf16.vlgmr.msra.gmra.mrb[16].mxu1 %vm379_vm1, %v684_v63  ;;  %v673_v25 = vmax.f32 %v629_v8, 0.0 }
 0x2b2   : > { %v624_v24 = vadd.f32 %v3875_v29, %v623_v21  ;;  %v671_v27 = vmax.f32 %v621_v14, 0.0 }
 0x2b3   : > { %v674_v26 = vmax.f32 %v632_v20, 0.0 }
 0x2b4   : > { %v672_v28 = vmax.f32 %v624_v24, 0.0 }
 0x2b5   : > { %v686_v30 = vpack.c.bf16 %v674_v26, %v673_v25 }
 0x2b6   : > { %v685_v31 = vpack.c.bf16 %v672_v28, %v671_v27  ;;  %v4368_v32 = vpop.f32.mrb[24].mxu0 }
 0x2b7   : > { %v645_v33 = vadd.f32 %v4368_v32, %v3875_v29  ;;  %v636_v34 = vpop.f32.mrb[25].mxu0 }
 0x2b8   : > { %v637_v35 = vadd.f32 %v3875_v29, %v636_v34  ;;  %v4369_v36 = vpop.f32.mrb[26].mxu0  ;;  %4382 = vmatprep.mubr.msk.bf16.mxu1 %vm379_vm1, %v685_v31 }
 0x2b9   : > { %v648_v37 = vadd.f32 %v4369_v36, %v3875_v29  ;;  %v639_v38 = vpop.f32.mrb[27].mxu0  ;;  %4383 = vmatmul.mubr.msk.bf16.gmra.mrb[20].mxu1 %vm379_vm1, %v686_v30  ;;  %v677_v40 = vmax.f32 %v645_v33, 0.0  ;;  %v4718_v36 = vld [vmem:[%s5733_s1 + $0x40] sm:$0xff]  }
 0x2ba   : > { %v640_v39 = vadd.f32 %v3875_v29, %v639_v38  ;;  %v675_v42 = vmax.f32 %v637_v35, 0.0  ;;  %4412 = vmatprep.subr.bf16.mxu1 %v4718_v36 }
 0x2bb   : > { %v678_v41 = vmax.f32 %v648_v37, 0.0  ;;  %4413 = vmatpush3.bf16.msra.mxu1 %v4718_v36  ;;  %v3896_v37 = vld [vmem:[%s5734_s2 + $0x3] ss:$0 sm:$0xff] }
 0x2bc   : > { %v676_v43 = vmax.f32 %v640_v39, 0.0 }
 0x2bd   : > { %v688_v44 = vpack.c.bf16 %v678_v41, %v677_v40 }
 0x2be   : > { %v687_v45 = vpack.c.bf16 %v676_v43, %v675_v42  ;;  %v4372_v46 = vpop.f32.mrb[28].mxu0 }
 0x2bf   : > { %v661_v47 = vadd.f32 %v4372_v46, %v3875_v29  ;;  %v652_v48 = vpop.f32.mrb[29].mxu0 }
 0x2c0   : > { %v653_v49 = vadd.f32 %v3875_v29, %v652_v48  ;;  %v4373_v50 = vpop.f32.mrb[30].mxu0  ;;  %4386 = vmatprep.mubr.msk.bf16.mxu1 %vm379_vm1, %v687_v45 }
 0x2c1   : > { %v664_v51 = vadd.f32 %v4373_v50, %v3875_v29  ;;  %v655_v52 = vpop.f32.mrb[31].mxu0  ;;  %4387 = vmatmul.mubr.msk.bf16.gmra.mrb[24].mxu1 %vm379_vm1, %v688_v44  ;;  %v681_v54 = vmax.f32 %v661_v47, 0.0 }
 0x2c2   : > { %v656_v53 = vadd.f32 %v3875_v29, %v655_v52  ;;  %v679_v56 = vmax.f32 %v653_v49, 0.0 }
 0x2c3   : > { %v682_v55 = vmax.f32 %v664_v51, 0.0 }
 0x2c4   : > { %v680_v57 = vmax.f32 %v656_v53, 0.0 }
 0x2c5   : > { %v690_v58 = vpack.c.bf16 %v682_v55, %v681_v54 }
 0x2c6   : > { %v689_v59 = vpack.c.bf16 %v680_v57, %v679_v56 }
 0x2c8   : > { %4390 = vmatprep.mubr.msk.bf16.mxu1 %vm379_vm1, %v689_v59 }
 0x2c9   : > { %4391 = vmatmul.mubr.msk.bf16.gmra.mrb[28].mxu1 %vm379_vm1, %v690_v58 }
 0x384   : > { %v4380_v60 = vpop.f32.mrb[16].mxu1 }
 0x385   : > { %v765_v61 = vpop.f32.mrb[17].mxu1 }
 0x386   : > { %v4381_v62 = vpop.f32.mrb[18].mxu1 }
 0x387   : > { %v829_v63 = vpack.c.bf16 %v4381_v62, %v4380_v60  ;;  %v768_v0 = vpop.f32.mrb[19].mxu1 }
 0x388   : > { %v828_v4 = vpack.c.bf16 %v768_v0, %v765_v61  ;;  %v4719_v0 = vld [vmem:[%s5733_s1 + $0x48] sm:$0xff]  }
 0x389   : > { %4430 = vmatprep.subr.bf16.mxu0 %v4719_v0 }
 0x38a   : > { %4396 = vmatprep.mubr.msk.bf16.mxu0 %vm212_vm0, %v828_v4  ;;  %v4720_v4 = vld [vmem:[%s5733_s1 + $0x50] sm:$0xff]  }
 0x38b   : > { %4397 = vmatmul.mubr.msk.bf16.vlgmr.msra.gmra.mrb[32].mxu0 %vm212_vm0, %v829_v63 }
 0x38c   : > { %v4384_v29 = vpop.f32.mrb[20].mxu1  ;;  %4431 = vmatpush3.bf16.msra.mxu0 %v4719_v0 }
 0x38d   : > { %v781_v8 = vpop.f32.mrb[21].mxu1  ;;  %4432 = vmatprep.subr.bf16.mxu0 %v4720_v4 }
 0x38e   : > { %v4385_v9 = vpop.f32.mrb[22].mxu1 }
 0x38f   : > { %v831_v14 = vpack.c.bf16 %v4385_v9, %v4384_v29  ;;  %v784_v15 = vpop.f32.mrb[23].mxu1 }
 0x390   : > { %v830_v20 = vpack.c.bf16 %v784_v15, %v781_v8  ;;  %4433 = vmatpush3.bf16.msra.mxu0 %v4720_v4 }
 0x392   : > { %4400 = vmatprep.mubr.msk.bf16.mxu0 %vm212_vm0, %v830_v20 }
 0x393   : > { %4401 = vmatmul.mubr.msk.bf16.gmra.mrb[36].mxu0 %vm212_vm0, %v831_v14 }
 0x394   : > { %v4388_v21 = vpop.f32.mrb[24].mxu1 }
 0x395   : > { %v797_v24 = vpop.f32.mrb[25].mxu1 }
 0x396   : > { %v4389_v25 = vpop.f32.mrb[26].mxu1 }
 0x397   : > { %v833_v26 = vpack.c.bf16 %v4389_v25, %v4388_v21  ;;  %v800_v27 = vpop.f32.mrb[27].mxu1 }
 0x398   : > { %v832_v28 = vpack.c.bf16 %v800_v27, %v797_v24 }
 0x39a   : > { %4404 = vmatprep.mubr.msk.bf16.mxu0 %vm212_vm0, %v832_v28 }
 0x39b   : > { %4405 = vmatmul.mubr.msk.bf16.gmra.mrb[40].mxu0 %vm212_vm0, %v833_v26 }
 0x39c   : > { %v4392_v30 = vpop.f32.mrb[28].mxu1 }
 0x39d   : > { %v813_v31 = vpop.f32.mrb[29].mxu1 }
 0x39e   : > { %v4393_v32 = vpop.f32.mrb[30].mxu1 }
 0x39f   : > { %v835_v33 = vpack.c.bf16 %v4393_v32, %v4392_v30  ;;  %v816_v34 = vpop.f32.mrb[31].mxu1 }
 0x3a0   : > { %v834_v35 = vpack.c.bf16 %v816_v34, %v813_v31 }
 0x3a2   : > { %4408 = vmatprep.mubr.msk.bf16.mxu0 %vm212_vm0, %v834_v35 }
 0x3a3   : > { %4409 = vmatmul.mubr.msk.bf16.gmra.mrb[44].mxu0 %vm212_vm0, %v835_v33 }
 0x45e   : > { %v4398_v38 = vpop.f32.mrb[32].mxu0 }
 0x45f   : > { %v4933_v39 = vadd.f32 %v4398_v38, %v3896_v37  ;;  %v907_v40 = vpop.f32.mrb[33].mxu0 }
 0x460   : > { %v4935_v41 = vadd.f32 %v3896_v37, %v907_v40  ;;  %v4399_v42 = vpop.f32.mrb[34].mxu0 }
 0x461   : > { %1006 = vrot.lane.b32.xlu1 %v4933_v39, %s4750_s21  ;;  %v910_v43 = vpop.f32.mrb[35].mxu0  ;;  %v4941_v44 = vadd.f32 %v4399_v42, %v3896_v37 }
 0x462   : > { %1002 = vrot.lane.b32.xlu0 %v4935_v41, %s4750_s21  ;;  %v4943_v45 = vadd.f32 %v3896_v37, %v910_v43 }
 0x465   : > { %1008 = vrot.lane.b32.xlu1 %v4941_v44, %s4750_s21 }
 0x466   : > { %1004 = vrot.lane.b32.xlu0 %v4943_v45, %s4750_s21  ;;  %v4402_v46 = vpop.f32.mrb[36].mxu0 }
 0x467   : > { %v923_v47 = vpop.f32.mrb[37].mxu0  ;;  %v4955_v52 = vadd.f32 %v4402_v46, %v3896_v37 }
 0x468   : > { %v4949_v48 = vadd.f32 %v3896_v37, %v923_v47  ;;  %v4403_v49 = vpop.f32.mrb[38].mxu0 }
 0x469   : > { %v926_v50 = vpop.f32.mrb[39].mxu0  ;;  %v4959_v53 = vadd.f32 %v4403_v49, %v3896_v37 }
 0x46a   : > { %v4951_v51 = vadd.f32 %v3896_v37, %v926_v50  ;;  %1010 = vrot.lane.b32.xlu0 %v4949_v48, %s4750_s21 }
 0x46c   : > { %1012 = vrot.lane.b32.xlu1 %v4951_v51, %s4750_s21 }
 0x46e   : > { %1014 = vrot.lane.b32.xlu0 %v4955_v52, %s4750_s21  ;;  %v4406_v54 = vpop.f32.mrb[40].mxu0 }
 0x46f   : > { %v939_v55 = vpop.f32.mrb[41].mxu0  ;;  %v4971_v60 = vadd.f32 %v4406_v54, %v3896_v37 }
 0x470   : > { %v4963_v56 = vadd.f32 %v3896_v37, %v939_v55  ;;  %1016 = vrot.lane.b32.xlu1 %v4959_v53, %s4750_s21  ;;  %v4407_v57 = vpop.f32.mrb[42].mxu0 }
 0x471   : > { %v942_v58 = vpop.f32.mrb[43].mxu0  ;;  %v4975_v61 = vadd.f32 %v4407_v57, %v3896_v37 }
 0x472   : > { %v4967_v59 = vadd.f32 %v3896_v37, %v942_v58  ;;  %1018 = vrot.lane.b32.xlu0 %v4963_v56, %s4750_s21 }
 0x474   : > { %1020 = vrot.lane.b32.xlu1 %v4967_v59, %s4750_s21 }
 0x476   : > { %1022 = vrot.lane.b32.xlu0 %v4971_v60, %s4750_s21  ;;  %v4410_v62 = vpop.f32.mrb[44].mxu0 }
 0x477   : > { %v955_v63 = vpop.f32.mrb[45].mxu0  ;;  %v4993_v15 = vadd.f32 %v4410_v62, %v3896_v37 }
 0x478   : > { %v4985_v29 = vadd.f32 %v3896_v37, %v955_v63  ;;  %1024 = vrot.lane.b32.xlu1 %v4975_v61, %s4750_s21  ;;  %v4411_v8 = vpop.f32.mrb[46].mxu0  ;;  %v4722_v63 = vld [vmem:[%s5733_s1 + $0x60] sm:$0xff]  }
 0x479   : > { %v958_v9 = vpop.f32.mrb[47].mxu0  ;;  %v4997_v20 = vadd.f32 %v4411_v8, %v3896_v37 }
 0x47a   : > { %v4989_v14 = vadd.f32 %v3896_v37, %v958_v9  ;;  %1026 = vrot.lane.b32.xlu0 %v4985_v29, %s4750_s21 }
 0x47c   : > { %1028 = vrot.lane.b32.xlu1 %v4989_v14, %s4750_s21 }
 0x47e   : > { %1030 = vrot.lane.b32.xlu0 %v4993_v15, %s4750_s21 }
 0x480   : > { %1032 = vrot.lane.b32.xlu1 %v4997_v20, %s4750_s21 }
 0x4d3   : > { %v1007_v21 = vpop.permute.xlu1 %1006 }
 0x4d4   : > { %v1003_v24 = vpop.permute.xlu0 %1002  ;;  %v5013_v31 = vsub.f32 %v4800_v3, %v1007_v21 }
 0x4d5   : > { %v5007_v28 = vsub.f32 %v4794_v1, %v1003_v24 }
 0x4d7   : > { %v1009_v25 = vpop.permute.xlu1 %1008 }
 0x4d8   : > { %v5004_v26 = vsub.f32 %v4805_v5, %v1009_v25  ;;  %v1005_v27 = vpop.permute.xlu0 %1004 }
 0x4d9   : > { %v5010_v30 = vsub.f32 %v4797_v2, %v1005_v27 }
 0x4da   : > { %v1067_v33 = vpack.c.bf16 %v5004_v26, %v5013_v31 }
 0x4db   : > { %v1066_v32 = vpack.c.bf16 %v5010_v30, %v5007_v28 }
 0x4dc   : > { %v1011_v34 = vpop.permute.xlu0 %1010 }
 0x4dd   : > { %4414 = vmatprep.mubr.msk.bf16.mxu1 %vm212_vm0, %v1066_v32  ;;  %v5022_v1 = vsub.f32 %v4808_v6, %v1011_v34 }
 0x4de   : > { %4415 = vmatmul.mubr.msk.bf16.vlgmr.msra.gmra.mrb[32].mxu1 %vm212_vm0, %v1067_v33  ;;  %v1013_v5 = vpop.permute.xlu1 %1012 }
 0x4df   : > { %v5025_v2 = vsub.f32 %v4811_v7, %v1013_v5 }
 0x4e0   : > { %v1015_v3 = vpop.permute.xlu0 %1014 }
 0x4e1   : > { %v1068_v35 = vpack.c.bf16 %v5025_v2, %v5022_v1  ;;  %v5030_v37 = vsub.f32 %v4820_v10, %v1015_v3 }
 0x4e2   : > { %v1017_v36 = vpop.permute.xlu1 %1016 }
 0x4e3   : > { %v5033_v38 = vsub.f32 %v4823_v11, %v1017_v36  ;;  %4418 = vmatprep.mubr.msk.bf16.mxu1 %vm212_vm0, %v1068_v35 }
 0x4e4   : > { %v1019_v40 = vpop.permute.xlu0 %1018 }
 0x4e5   : > { %v1069_v6 = vpack.c.bf16 %v5033_v38, %v5030_v37  ;;  %v5039_v7 = vsub.f32 %v4826_v12, %v1019_v40 }
 0x4e6   : > { %v1021_v42 = vpop.permute.xlu1 %1020 }
 0x4e7   : > { %v5042_v43 = vsub.f32 %v4830_v13, %v1021_v42  ;;  %4419 = vmatmul.mubr.msk.bf16.gmra.mrb[36].mxu1 %vm212_vm0, %v1069_v6 }
 0x4e8   : > { %v1023_v10 = vpop.permute.xlu0 %1022 }
 0x4e9   : > { %v1070_v11 = vpack.c.bf16 %v5042_v43, %v5039_v7  ;;  %v5048_v47 = vsub.f32 %v4837_v16, %v1023_v10 }
 0x4ea   : > { %v1025_v46 = vpop.permute.xlu1 %1024 }
 0x4eb   : > { %v5051_v49 = vsub.f32 %v4840_v17, %v1025_v46  ;;  %4422 = vmatprep.mubr.msk.bf16.mxu1 %vm212_vm0, %v1070_v11 }
 0x4ec   : > { %v1027_v12 = vpop.permute.xlu0 %1026 }
 0x4ed   : > { %v1071_v13 = vpack.c.bf16 %v5051_v49, %v5048_v47  ;;  %v5057_v54 = vsub.f32 %v4844_v18, %v1027_v12 }
 0x4ee   : > { %v1029_v50 = vpop.permute.xlu1 %1028 }
 0x4ef   : > { %v5060_v55 = vsub.f32 %v4847_v19, %v1029_v50  ;;  %4423 = vmatmul.mubr.msk.bf16.gmra.mrb[40].mxu1 %vm212_vm0, %v1071_v13  ;;  %v4721_v19 = vld [vmem:[%s5733_s1 + $0x58] sm:$0xff]  }
 0x4f0   : > { %v1031_v16 = vpop.permute.xlu0 %1030  ;;  %4450 = vmatprep.subr.bf16.mxu1 %v4721_v19 }
 0x4f1   : > { %v1072_v17 = vpack.c.bf16 %v5060_v55, %v5057_v54  ;;  %v5066_v58 = vsub.f32 %v4857_v22, %v1031_v16  ;;  %4451 = vmatpush3.bf16.msra.mxu1 %v4721_v19  ;;  %v3909_v22 = vld [vmem:[%s5734_s2 + $0x4] ss:$0 sm:$0xff] }
 0x4f2   : > { %v1033_v57 = vpop.permute.xlu1 %1032  ;;  %4452 = vmatprep.subr.bf16.mxu1 %v4722_v63 }
 0x4f3   : > { %v5069_v62 = vsub.f32 %v4860_v23, %v1033_v57  ;;  %4426 = vmatprep.mubr.msk.bf16.mxu1 %vm212_vm0, %v1072_v17 }
 0x4f5   : > { %v1073_v18 = vpack.c.bf16 %v5069_v62, %v5066_v58  ;;  %4453 = vmatpush3.bf16.msra.mxu1 %v4722_v63 }
 0x4f7   : > { %4427 = vmatmul.mubr.msk.bf16.gmra.mrb[44].mxu1 %vm212_vm0, %v1073_v18 }
 0x5b1   : > { %v4416_v23 = vpop.f32.mrb[32].mxu1 }
 0x5b2   : > { %v1156_v0 = vadd.f32 %v4416_v23, %v3909_v22  ;;  %v1147_v4 = vpop.f32.mrb[33].mxu1 }
 0x5b3   : > { %v1148_v8 = vadd.f32 %v3909_v22, %v1147_v4  ;;  %v4417_v9 = vpop.f32.mrb[34].mxu1 }
 0x5b4   : > { %v1159_v21 = vadd.f32 %v4417_v9, %v3909_v22  ;;  %v1150_v24 = vpop.f32.mrb[35].mxu1  ;;  %v1212_v27 = vmax.f32 %v1156_v0, 0.0 }
 0x5b5   : > { %v1151_v25 = vadd.f32 %v3909_v22, %v1150_v24  ;;  %v1210_v33 = vmax.f32 %v1148_v8, 0.0 }
 0x5b6   : > { %v1213_v32 = vmax.f32 %v1159_v21, 0.0 }
 0x5b7   : > { %v1211_v34 = vmax.f32 %v1151_v25, 0.0 }
 0x5b8   : > { %v1227_v5 = vpack.c.bf16 %v1213_v32, %v1212_v27 }
 0x5b9   : > { %v1226_v3 = vpack.c.bf16 %v1211_v34, %v1210_v33 }
 0x5ba   : > { %v4420_v35 = vpop.f32.mrb[36].mxu1 }
 0x5bb   : > { %v1172_v36 = vadd.f32 %v4420_v35, %v3909_v22  ;;  %v1163_v40 = vpop.f32.mrb[37].mxu1  ;;  %4434 = vmatprep.mubr.msk.bf16.mxu0 %vm379_vm1, %v1226_v3 }
 0x5bc   : > { %v1164_v6 = vadd.f32 %v3909_v22, %v1163_v40  ;;  %v4421_v42 = vpop.f32.mrb[38].mxu1  ;;  %4435 = vmatmul.mubr.msk.bf16.vlgmr.msra.gmra.mrb[48].mxu0 %vm379_vm1, %v1227_v5 }
 0x5bd   : > { %v1175_v10 = vadd.f32 %v4421_v42, %v3909_v22  ;;  %v1166_v11 = vpop.f32.mrb[39].mxu1  ;;  %v1216_v12 = vmax.f32 %v1172_v36, 0.0 }
 0x5be   : > { %v1167_v46 = vadd.f32 %v3909_v22, %v1166_v11  ;;  %v1214_v50 = vmax.f32 %v1164_v6, 0.0 }
 0x5bf   : > { %v1217_v13 = vmax.f32 %v1175_v10, 0.0 }
 0x5c0   : > { %v1215_v16 = vmax.f32 %v1167_v46, 0.0 }
 0x5c1   : > { %v1229_v17 = vpack.c.bf16 %v1217_v13, %v1216_v12 }
 0x5c2   : > { %v1228_v57 = vpack.c.bf16 %v1215_v16, %v1214_v50  ;;  %v4424_v18 = vpop.f32.mrb[40].mxu1  ;;  %v4723_v16 = vld [vmem:[%s5733_s1 + $0x68] sm:$0xff]  }
 0x5c3   : > { %v1188_v19 = vadd.f32 %v4424_v18, %v3909_v22  ;;  %v1179_v63 = vpop.f32.mrb[41].mxu1  ;;  %4470 = vmatprep.subr.bf16.mxu0 %v4723_v16 }
 0x5c4   : > { %v1180_v23 = vadd.f32 %v3909_v22, %v1179_v63  ;;  %v4425_v0 = vpop.f32.mrb[42].mxu1  ;;  %4438 = vmatprep.mubr.msk.bf16.mxu0 %vm379_vm1, %v1228_v57  ;;  %4471 = vmatpush3.bf16.msra.mxu0 %v4723_v16 }
 0x5c5   : > { %v1191_v4 = vadd.f32 %v4425_v0, %v3909_v22  ;;  %v1182_v8 = vpop.f32.mrb[43].mxu1  ;;  %4439 = vmatmul.mubr.msk.bf16.gmra.mrb[52].mxu0 %vm379_vm1, %v1229_v17  ;;  %v1220_v21 = vmax.f32 %v1188_v19, 0.0  ;;  %v4724_v17 = vld [vmem:[%s5733_s1 + $0x70] sm:$0xff]  }
 0x5c6   : > { %v1183_v9 = vadd.f32 %v3909_v22, %v1182_v8  ;;  %v1218_v25 = vmax.f32 %v1180_v23, 0.0  ;;  %4472 = vmatprep.subr.bf16.mxu0 %v4724_v17 }
 0x5c7   : > { %v1221_v24 = vmax.f32 %v1191_v4, 0.0 }
 0x5c8   : > { %v1219_v27 = vmax.f32 %v1183_v9, 0.0  ;;  %4473 = vmatpush3.bf16.msra.mxu0 %v4724_v17 }
 0x5c9   : > { %v1231_v32 = vpack.c.bf16 %v1221_v24, %v1220_v21 }
 0x5ca   : > { %v1230_v33 = vpack.c.bf16 %v1219_v27, %v1218_v25  ;;  %v4428_v34 = vpop.f32.mrb[44].mxu1 }
 0x5cb   : > { %v1204_v5 = vadd.f32 %v4428_v34, %v3909_v22  ;;  %v1195_v3 = vpop.f32.mrb[45].mxu1 }
 0x5cc   : > { %v1196_v35 = vadd.f32 %v3909_v22, %v1195_v3  ;;  %v4429_v36 = vpop.f32.mrb[46].mxu1  ;;  %4442 = vmatprep.mubr.msk.bf16.mxu0 %vm379_vm1, %v1230_v33 }
 0x5cd   : > { %v1207_v40 = vadd.f32 %v4429_v36, %v3909_v22  ;;  %v1198_v6 = vpop.f32.mrb[47].mxu1  ;;  %4443 = vmatmul.mubr.msk.bf16.gmra.mrb[56].mxu0 %vm379_vm1, %v1231_v32  ;;  %v1224_v10 = vmax.f32 %v1204_v5, 0.0 }
 0x5ce   : > { %v1199_v42 = vadd.f32 %v3909_v22, %v1198_v6  ;;  %v1222_v46 = vmax.f32 %v1196_v35, 0.0  ;;  %v3924_v22 = vld [vmem:[%s5734_s2 + $0x5] ss:$0 sm:$0xff] }
 0x5cf   : > { %v1225_v11 = vmax.f32 %v1207_v40, 0.0 }
 0x5d0   : > { %v1223_v12 = vmax.f32 %v1199_v42, 0.0 }
 0x5d1   : > { %v1233_v13 = vpack.c.bf16 %v1225_v11, %v1224_v10 }
 0x5d2   : > { %v1232_v50 = vpack.c.bf16 %v1223_v12, %v1222_v46 }
 0x5d4   : > { %4446 = vmatprep.mubr.msk.bf16.mxu0 %vm379_vm1, %v1232_v50 }
 0x5d5   : > { %4447 = vmatmul.mubr.msk.bf16.gmra.mrb[60].mxu0 %vm379_vm1, %v1233_v13 }
 0x68f   : > { %v4436_v57 = vpop.f32.mrb[48].mxu0 }
 0x690   : > { %v1322_v18 = vadd.f32 %v4436_v57, %v3924_v22  ;;  %v1313_v19 = vpop.f32.mrb[49].mxu0 }
 0x691   : > { %v1314_v63 = vadd.f32 %v3924_v22, %v1313_v19  ;;  %v4437_v23 = vpop.f32.mrb[50].mxu0 }
 0x692   : > { %v1325_v0 = vadd.f32 %v4437_v23, %v3924_v22  ;;  %v1316_v4 = vpop.f32.mrb[51].mxu0  ;;  %v1378_v9 = vmax.f32 %v1322_v18, 0.0 }
 0x693   : > { %v1317_v8 = vadd.f32 %v3924_v22, %v1316_v4  ;;  %v1376_v24 = vmax.f32 %v1314_v63, 0.0 }
 0x694   : > { %v1379_v21 = vmax.f32 %v1325_v0, 0.0 }
 0x695   : > { %v1377_v25 = vmax.f32 %v1317_v8, 0.0 }
 0x696   : > { %v1393_v27 = vpack.c.bf16 %v1379_v21, %v1378_v9 }
 0x697   : > { %v1392_v32 = vpack.c.bf16 %v1377_v25, %v1376_v24 }
 0x698   : > { %v4440_v33 = vpop.f32.mrb[52].mxu0 }
 0x699   : > { %v1338_v34 = vadd.f32 %v4440_v33, %v3924_v22  ;;  %v1329_v5 = vpop.f32.mrb[53].mxu0  ;;  %4454 = vmatprep.mubr.msk.bf16.mxu1 %vm379_vm1, %v1392_v32 }
 0x69a   : > { %v1330_v3 = vadd.f32 %v3924_v22, %v1329_v5  ;;  %v4441_v35 = vpop.f32.mrb[54].mxu0  ;;  %4455 = vmatmul.mubr.msk.bf16.vlgmr.msra.gmra.mrb[48].mxu1 %vm379_vm1, %v1393_v27 }
 0x69b   : > { %v1341_v36 = vadd.f32 %v4441_v35, %v3924_v22  ;;  %v1332_v40 = vpop.f32.mrb[55].mxu0  ;;  %v1382_v42 = vmax.f32 %v1338_v34, 0.0 }
 0x69c   : > { %v1333_v6 = vadd.f32 %v3924_v22, %v1332_v40  ;;  %v1380_v11 = vmax.f32 %v1330_v3, 0.0 }
 0x69d   : > { %v1383_v10 = vmax.f32 %v1341_v36, 0.0 }
 0x69e   : > { %v1381_v46 = vmax.f32 %v1333_v6, 0.0 }
 0x69f   : > { %v1395_v12 = vpack.c.bf16 %v1383_v10, %v1382_v42 }
 0x6a0   : > { %v1394_v13 = vpack.c.bf16 %v1381_v46, %v1380_v11  ;;  %v4444_v50 = vpop.f32.mrb[56].mxu0  ;;  %v4725_v46 = vld [vmem:[%s5733_s1 + $0x78] sm:$0xff]  }
 0x6a1   : > { %v1354_v16 = vadd.f32 %v4444_v50, %v3924_v22  ;;  %v1345_v17 = vpop.f32.mrb[57].mxu0  ;;  %4490 = vmatprep.subr.bf16.mxu1 %v4725_v46 }
 0x6a2   : > { %v1346_v57 = vadd.f32 %v3924_v22, %v1345_v17  ;;  %v4445_v18 = vpop.f32.mrb[58].mxu0  ;;  %4458 = vmatprep.mubr.msk.bf16.mxu1 %vm379_vm1, %v1394_v13  ;;  %4491 = vmatpush3.bf16.msra.mxu1 %v4725_v46 }
 0x6a3   : > { %v1357_v19 = vadd.f32 %v4445_v18, %v3924_v22  ;;  %v1348_v63 = vpop.f32.mrb[59].mxu0  ;;  %4459 = vmatmul.mubr.msk.bf16.gmra.mrb[52].mxu1 %vm379_vm1, %v1395_v12  ;;  %v1386_v0 = vmax.f32 %v1354_v16, 0.0 }
 0x6a4   : > { %v1349_v23 = vadd.f32 %v3924_v22, %v1348_v63  ;;  %v1384_v8 = vmax.f32 %v1346_v57, 0.0 }
 0x6a5   : > { %v1387_v4 = vmax.f32 %v1357_v19, 0.0 }
 0x6a6   : > { %v1385_v9 = vmax.f32 %v1349_v23, 0.0 }
 0x6a7   : > { %v1397_v21 = vpack.c.bf16 %v1387_v4, %v1386_v0 }
 0x6a8   : > { %v1396_v24 = vpack.c.bf16 %v1385_v9, %v1384_v8  ;;  %v4448_v25 = vpop.f32.mrb[60].mxu0 }
 0x6a9   : > { %v1370_v27 = vadd.f32 %v4448_v25, %v3924_v22  ;;  %v1361_v32 = vpop.f32.mrb[61].mxu0 }
 0x6aa   : > { %v1362_v33 = vadd.f32 %v3924_v22, %v1361_v32  ;;  %v4449_v34 = vpop.f32.mrb[62].mxu0  ;;  %4462 = vmatprep.mubr.msk.bf16.mxu1 %vm379_vm1, %v1396_v24 }
 0x6ab   : > { %v1373_v5 = vadd.f32 %v4449_v34, %v3924_v22  ;;  %v1364_v3 = vpop.f32.mrb[63].mxu0  ;;  %4463 = vmatmul.mubr.msk.bf16.gmra.mrb[56].mxu1 %vm379_vm1, %v1397_v21  ;;  %v1390_v36 = vmax.f32 %v1370_v27, 0.0 }
 0x6ac   : > { %v1365_v35 = vadd.f32 %v3924_v22, %v1364_v3  ;;  %v1388_v6 = vmax.f32 %v1362_v33, 0.0  ;;  %v3940_v22 = vld [vmem:[%s5734_s2 + $0x6] ss:$0 sm:$0xff] }
 0x6ad   : > { %v1391_v40 = vmax.f32 %v1373_v5, 0.0 }
 0x6ae   : > { %v1389_v42 = vmax.f32 %v1365_v35, 0.0 }
 0x6af   : > { %v1399_v10 = vpack.c.bf16 %v1391_v40, %v1390_v36 }
 0x6b0   : > { %v1398_v11 = vpack.c.bf16 %v1389_v42, %v1388_v6 }
 0x6b2   : > { %4466 = vmatprep.mubr.msk.bf16.mxu1 %vm379_vm1, %v1398_v11 }
 0x6b3   : > { %4467 = vmatmul.mubr.msk.bf16.gmra.mrb[60].mxu1 %vm379_vm1, %v1399_v10 }
 0x76d   : > { %v4456_v12 = vpop.f32.mrb[48].mxu1 }
 0x76e   : > { %v1488_v13 = vadd.f32 %v4456_v12, %v3940_v22  ;;  %v1479_v50 = vpop.f32.mrb[49].mxu1 }
 0x76f   : > { %v1480_v16 = vadd.f32 %v3940_v22, %v1479_v50  ;;  %v4457_v17 = vpop.f32.mrb[50].mxu1 }
 0x770   : > { %v1491_v57 = vadd.f32 %v4457_v17, %v3940_v22  ;;  %v1482_v18 = vpop.f32.mrb[51].mxu1  ;;  %v1544_v63 = vmax.f32 %v1488_v13, 0.0 }
 0x771   : > { %v1483_v19 = vadd.f32 %v3940_v22, %v1482_v18  ;;  %v1542_v0 = vmax.f32 %v1480_v16, 0.0 }
 0x772   : > { %v1545_v23 = vmax.f32 %v1491_v57, 0.0 }
 0x773   : > { %v1543_v4 = vmax.f32 %v1483_v19, 0.0 }
 0x774   : > { %v1559_v8 = vpack.c.bf16 %v1545_v23, %v1544_v63 }
 0x775   : > { %v1558_v9 = vpack.c.bf16 %v1543_v4, %v1542_v0 }
 0x776   : > { %v4460_v21 = vpop.f32.mrb[52].mxu1 }
 0x777   : > { %v1504_v24 = vadd.f32 %v4460_v21, %v3940_v22  ;;  %v1495_v25 = vpop.f32.mrb[53].mxu1  ;;  %4474 = vmatprep.mubr.msk.bf16.mxu0 %vm379_vm1, %v1558_v9 }
 0x778   : > { %v1496_v27 = vadd.f32 %v3940_v22, %v1495_v25  ;;  %v4461_v32 = vpop.f32.mrb[54].mxu1  ;;  %4475 = vmatmul.mubr.msk.bf16.vlgmr.msra.gmra.mrb[64].mxu0 %vm379_vm1, %v1559_v8 }
 0x779   : > { %v1507_v33 = vadd.f32 %v4461_v32, %v3940_v22  ;;  %v1498_v34 = vpop.f32.mrb[55].mxu1  ;;  %v1548_v3 = vmax.f32 %v1504_v24, 0.0 }
 0x77a   : > { %v1499_v5 = vadd.f32 %v3940_v22, %v1498_v34  ;;  %v1546_v36 = vmax.f32 %v1496_v27, 0.0 }
 0x77b   : > { %v1549_v35 = vmax.f32 %v1507_v33, 0.0 }
 0x77c   : > { %v1547_v40 = vmax.f32 %v1499_v5, 0.0 }
 0x77d   : > { %v1561_v6 = vpack.c.bf16 %v1549_v35, %v1548_v3 }
 0x77e   : > { %v1560_v42 = vpack.c.bf16 %v1547_v40, %v1546_v36  ;;  %v4464_v10 = vpop.f32.mrb[56].mxu1 }
 0x77f   : > { %v1520_v11 = vadd.f32 %v4464_v10, %v3940_v22  ;;  %v1511_v46 = vpop.f32.mrb[57].mxu1 }
 0x780   : > { %v1512_v12 = vadd.f32 %v3940_v22, %v1511_v46  ;;  %v4465_v13 = vpop.f32.mrb[58].mxu1  ;;  %4478 = vmatprep.mubr.msk.bf16.mxu0 %vm379_vm1, %v1560_v42 }
 0x781   : > { %v1523_v50 = vadd.f32 %v4465_v13, %v3940_v22  ;;  %v1514_v16 = vpop.f32.mrb[59].mxu1  ;;  %4479 = vmatmul.mubr.msk.bf16.gmra.mrb[68].mxu0 %vm379_vm1, %v1561_v6  ;;  %v1552_v57 = vmax.f32 %v1520_v11, 0.0 }
 0x782   : > { %v1515_v17 = vadd.f32 %v3940_v22, %v1514_v16  ;;  %v1550_v19 = vmax.f32 %v1512_v12, 0.0 }
 0x783   : > { %v1553_v18 = vmax.f32 %v1523_v50, 0.0 }
 0x784   : > { %v1551_v63 = vmax.f32 %v1515_v17, 0.0 }
 0x785   : > { %v1563_v23 = vpack.c.bf16 %v1553_v18, %v1552_v57 }
 0x786   : > { %v1562_v0 = vpack.c.bf16 %v1551_v63, %v1550_v19  ;;  %v4468_v4 = vpop.f32.mrb[60].mxu1 }
 0x787   : > { %v1536_v8 = vadd.f32 %v4468_v4, %v3940_v22  ;;  %v1527_v9 = vpop.f32.mrb[61].mxu1 }
 0x788   : > { %v1528_v21 = vadd.f32 %v3940_v22, %v1527_v9  ;;  %v4469_v24 = vpop.f32.mrb[62].mxu1  ;;  %4482 = vmatprep.mubr.msk.bf16.mxu0 %vm379_vm1, %v1562_v0 }
 0x789   : > { %v1539_v25 = vadd.f32 %v4469_v24, %v3940_v22  ;;  %v1530_v27 = vpop.f32.mrb[63].mxu1  ;;  %4483 = vmatmul.mubr.msk.bf16.gmra.mrb[72].mxu0 %vm379_vm1, %v1563_v23  ;;  %v1556_v33 = vmax.f32 %v1536_v8, 0.0 }
 0x78a   : > { %v1531_v32 = vadd.f32 %v3940_v22, %v1530_v27  ;;  %v1554_v5 = vmax.f32 %v1528_v21, 0.0  ;;  %v4726_v27 = vld [vmem:[%s5733_s1 + $0x80] sm:$0xff]  }
 0x78b   : > { %v1557_v34 = vmax.f32 %v1539_v25, 0.0  ;;  %4508 = vmatprep.subr.bf16.mxu0 %v4726_v27 }
 0x78c   : > { %v1555_v3 = vmax.f32 %v1531_v32, 0.0  ;;  %4509 = vmatpush3.bf16.msra.mxu0 %v4726_v27  ;;  %v3968_v32 = vld [vmem:[%s5734_s2 + $0x7] ss:$0 sm:$0xff] }
 0x78d   : > { %v1565_v35 = vpack.c.bf16 %v1557_v34, %v1556_v33 }
 0x78e   : > { %v1564_v36 = vpack.c.bf16 %v1555_v3, %v1554_v5 }
 0x790   : > { %4486 = vmatprep.mubr.msk.bf16.mxu0 %vm379_vm1, %v1564_v36 }
 0x791   : > { %4487 = vmatmul.mubr.msk.bf16.gmra.mrb[76].mxu0 %vm379_vm1, %v1565_v35 }
 0x84b   : > { %v4476_v40 = vpop.f32.mrb[64].mxu0 }
 0x84c   : > { %v1640_v6 = vpop.f32.mrb[65].mxu0 }
 0x84d   : > { %v4477_v42 = vpop.f32.mrb[66].mxu0 }
 0x84e   : > { %v1704_v10 = vpack.c.bf16 %v4477_v42, %v4476_v40  ;;  %v1643_v11 = vpop.f32.mrb[67].mxu0 }
 0x84f   : > { %v1703_v46 = vpack.c.bf16 %v1643_v11, %v1640_v6 }
 0x851   : > { %4492 = vmatprep.mubr.msk.bf16.mxu1 %vm212_vm0, %v1703_v46 }
 0x852   : > { %4493 = vmatmul.mubr.msk.bf16.vlgmr.msra.gmra.mrb[64].mxu1 %vm212_vm0, %v1704_v10 }
 0x854   : > { %v4480_v22 = vpop.f32.mrb[68].mxu0 }
 0x855   : > { %v1656_v12 = vpop.f32.mrb[69].mxu0 }
 0x856   : > { %v4481_v13 = vpop.f32.mrb[70].mxu0 }
 0x857   : > { %v1706_v50 = vpack.c.bf16 %v4481_v13, %v4480_v22  ;;  %v1659_v16 = vpop.f32.mrb[71].mxu0 }
 0x858   : > { %v1705_v17 = vpack.c.bf16 %v1659_v16, %v1656_v12 }
 0x85a   : > { %4496 = vmatprep.mubr.msk.bf16.mxu1 %vm212_vm0, %v1705_v17 }
 0x85b   : > { %4497 = vmatmul.mubr.msk.bf16.gmra.mrb[68].mxu1 %vm212_vm0, %v1706_v50 }
 0x85c   : > { %v4484_v57 = vpop.f32.mrb[72].mxu0 }
 0x85d   : > { %v1672_v18 = vpop.f32.mrb[73].mxu0 }
 0x85e   : > { %v4485_v19 = vpop.f32.mrb[74].mxu0 }
 0x85f   : > { %v1708_v63 = vpack.c.bf16 %v4485_v19, %v4484_v57  ;;  %v1675_v23 = vpop.f32.mrb[75].mxu0 }
 0x860   : > { %v1707_v0 = vpack.c.bf16 %v1675_v23, %v1672_v18 }
 0x862   : > { %4500 = vmatprep.mubr.msk.bf16.mxu1 %vm212_vm0, %v1707_v0 }
 0x863   : > { %4501 = vmatmul.mubr.msk.bf16.gmra.mrb[72].mxu1 %vm212_vm0, %v1708_v63 }
 0x864   : > { %v4488_v4 = vpop.f32.mrb[76].mxu0 }
 0x865   : > { %v1688_v8 = vpop.f32.mrb[77].mxu0 }
 0x866   : > { %v4489_v9 = vpop.f32.mrb[78].mxu0 }
 0x867   : > { %v1710_v21 = vpack.c.bf16 %v4489_v9, %v4488_v4  ;;  %v1691_v24 = vpop.f32.mrb[79].mxu0  ;;  %v4727_v9 = vld [vmem:[%s5733_s1 + $0x88] sm:$0xff]  }
 0x868   : > { %v1709_v25 = vpack.c.bf16 %v1691_v24, %v1688_v8  ;;  %4526 = vmatprep.subr.bf16.mxu1 %v4727_v9 }
 0x869   : > { %4527 = vmatpush3.bf16.msra.mxu1 %v4727_v9 }
 0x86a   : > { %4504 = vmatprep.mubr.msk.bf16.mxu1 %vm212_vm0, %v1709_v25 }
 0x86b   : > { %4505 = vmatmul.mubr.msk.bf16.gmra.mrb[76].mxu1 %vm212_vm0, %v1710_v21  ;;  %v4728_v21 = vld [vmem:[%s5733_s1 + $0x90] sm:$0xff]  }
 0x86c   : > { %4528 = vmatprep.subr.bf16.mxu1 %v4728_v21 }
 0x86d   : > { %4529 = vmatpush3.bf16.msra.mxu1 %v4728_v21 }
 0x925   : > { %v4494_v33 = vpop.f32.mrb[64].mxu1 }
 0x926   : > { %v1782_v34 = vpop.f32.mrb[65].mxu1  ;;  %v5143_v40 = vadd.f32 %v4494_v33, %v3968_v32 }
 0x927   : > { %v5137_v5 = vadd.f32 %v3968_v32, %v1782_v34  ;;  %v4495_v3 = vpop.f32.mrb[66].mxu1 }
 0x928   : > { %v1785_v35 = vpop.f32.mrb[67].mxu1  ;;  %v5147_v6 = vadd.f32 %v4495_v3, %v3968_v32 }
 0x929   : > { %v5139_v36 = vadd.f32 %v3968_v32, %v1785_v35  ;;  %1877 = vrot.lane.b32.xlu0 %v5137_v5, %s4750_s21 }
 0x92b   : > { %1879 = vrot.lane.b32.xlu1 %v5139_v36, %s4750_s21 }
 0x92d   : > { %1881 = vrot.lane.b32.xlu0 %v5143_v40, %s4750_s21 }
 0x92e   : > { %v4498_v42 = vpop.f32.mrb[68].mxu1 }
 0x92f   : > { %v1798_v10 = vpop.f32.mrb[69].mxu1  ;;  %1883 = vrot.lane.b32.xlu1 %v5147_v6, %s4750_s21  ;;  %v5159_v13 = vadd.f32 %v4498_v42, %v3968_v32 }
 0x930   : > { %v5153_v11 = vadd.f32 %v3968_v32, %v1798_v10  ;;  %v4499_v46 = vpop.f32.mrb[70].mxu1 }
 0x931   : > { %v1801_v22 = vpop.f32.mrb[71].mxu1  ;;  %v5163_v50 = vadd.f32 %v4499_v46, %v3968_v32 }
 0x932   : > { %v5155_v12 = vadd.f32 %v3968_v32, %v1801_v22  ;;  %1885 = vrot.lane.b32.xlu0 %v5153_v11, %s4750_s21 }
 0x934   : > { %1887 = vrot.lane.b32.xlu1 %v5155_v12, %s4750_s21 }
 0x936   : > { %v4502_v16 = vpop.f32.mrb[72].mxu1  ;;  %1889 = vrot.lane.b32.xlu0 %v5159_v13, %s4750_s21 }
 0x937   : > { %v1814_v17 = vpop.f32.mrb[73].mxu1  ;;  %v5175_v23 = vadd.f32 %v4502_v16, %v3968_v32 }
 0x938   : > { %v5167_v57 = vadd.f32 %v3968_v32, %v1814_v17  ;;  %v4503_v18 = vpop.f32.mrb[74].mxu1  ;;  %1891 = vrot.lane.b32.xlu1 %v5163_v50, %s4750_s21 }
 0x939   : > { %v1817_v19 = vpop.f32.mrb[75].mxu1  ;;  %v5179_v0 = vadd.f32 %v4503_v18, %v3968_v32 }
 0x93a   : > { %v5171_v63 = vadd.f32 %v3968_v32, %v1817_v19  ;;  %1893 = vrot.lane.b32.xlu0 %v5167_v57, %s4750_s21 }
 0x93c   : > { %1895 = vrot.lane.b32.xlu1 %v5171_v63, %s4750_s21 }
 0x93e   : > { %1897 = vrot.lane.b32.xlu0 %v5175_v23, %s4750_s21  ;;  %v4506_v4 = vpop.f32.mrb[76].mxu1 }
 0x93f   : > { %v1830_v8 = vpop.f32.mrb[77].mxu1  ;;  %v5197_v34 = vadd.f32 %v4506_v4, %v3968_v32 }
 0x940   : > { %v5189_v24 = vadd.f32 %v3968_v32, %v1830_v8  ;;  %1899 = vrot.lane.b32.xlu1 %v5179_v0, %s4750_s21  ;;  %v4507_v25 = vpop.f32.mrb[78].mxu1 }
 0x941   : > { %v1833_v27 = vpop.f32.mrb[79].mxu1  ;;  %v5201_v3 = vadd.f32 %v4507_v25, %v3968_v32 }
 0x942   : > { %v5193_v33 = vadd.f32 %v3968_v32, %v1833_v27  ;;  %1901 = vrot.lane.b32.xlu0 %v5189_v24, %s4750_s21 }
 0x944   : > { %1903 = vrot.lane.b32.xlu1 %v5193_v33, %s4750_s21 }
 0x946   : > { %1905 = vrot.lane.b32.xlu0 %v5197_v34, %s4750_s21 }
 0x948   : > { %1907 = vrot.lane.b32.xlu1 %v5201_v3, %s4750_s21 }
 0x99b   : > { %v1878_v35 = vpop.permute.xlu0 %1877 }
 0x99c   : > { %v5208_v10 = vsub.f32 %v5007_v28, %v1878_v35 }
 0x99d   : > { %v1880_v42 = vpop.permute.xlu1 %1879 }
 0x99e   : > { %v5211_v46 = vsub.f32 %v5010_v30, %v1880_v42 }
 0x99f   : > { %v1882_v22 = vpop.permute.xlu0 %1881 }
 0x9a0   : > { %v1941_v32 = vpack.c.bf16 %v5211_v46, %v5208_v10  ;;  %v5216_v17 = vsub.f32 %v5013_v31, %v1882_v22 }
 0x9a1   : > { %v1884_v16 = vpop.permute.xlu1 %1883 }
 0x9a2   : > { %v5219_v18 = vsub.f32 %v5004_v26, %v1884_v16  ;;  %4510 = vmatprep.mubr.msk.bf16.mxu0 %vm212_vm0, %v1941_v32 }
 0x9a4   : > { %v1942_v28 = vpack.c.bf16 %v5219_v18, %v5216_v17  ;;  %v1886_v19 = vpop.permute.xlu0 %1885 }
 0x9a5   : > { %v5226_v30 = vsub.f32 %v5022_v1, %v1886_v19 }
 0x9a6   : > { %v1888_v4 = vpop.permute.xlu1 %1887  ;;  %4511 = vmatmul.mubr.msk.bf16.vlgmr.msra.gmra.mrb[80].mxu0 %vm212_vm0, %v1942_v28 }
 0x9a7   : > { %v5229_v8 = vsub.f32 %v5025_v2, %v1888_v4 }
 0x9a8   : > { %v1890_v31 = vpop.permute.xlu0 %1889 }
 0x9a9   : > { %v1943_v26 = vpack.c.bf16 %v5229_v8, %v5226_v30  ;;  %v5234_v21 = vsub.f32 %v5030_v37, %v1890_v31 }
 0x9aa   : > { %v1892_v9 = vpop.permute.xlu1 %1891 }
 0x9ab   : > { %v5237_v25 = vsub.f32 %v5033_v38, %v1892_v9  ;;  %4514 = vmatprep.mubr.msk.bf16.mxu0 %vm212_vm0, %v1943_v26 }
 0x9ac   : > { %v1894_v27 = vpop.permute.xlu0 %1893 }
 0x9ad   : > { %v1944_v1 = vpack.c.bf16 %v5237_v25, %v5234_v21  ;;  %v5243_v2 = vsub.f32 %v5039_v7, %v1894_v27  ;;  %v4730_v27 = vld [vmem:[%s5733_s1 + $0xa0] sm:$0xff]  }
 0x9ae   : > { %v1896_v35 = vpop.permute.xlu1 %1895 }
 0x9af   : > { %v5246_v42 = vsub.f32 %v5042_v43, %v1896_v35  ;;  %4515 = vmatmul.mubr.msk.bf16.gmra.mrb[84].mxu0 %vm212_vm0, %v1944_v1 }
 0x9b0   : > { %v1898_v37 = vpop.permute.xlu0 %1897 }
 0x9b1   : > { %v1945_v38 = vpack.c.bf16 %v5246_v42, %v5243_v2  ;;  %v5252_v32 = vsub.f32 %v5048_v47, %v1898_v37 }
 0x9b2   : > { %v1900_v22 = vpop.permute.xlu1 %1899 }
 0x9b3   : > { %v5255_v16 = vsub.f32 %v5051_v49, %v1900_v22  ;;  %4518 = vmatprep.mubr.msk.bf16.mxu0 %vm212_vm0, %v1945_v38 }
 0x9b4   : > { %v1902_v7 = vpop.permute.xlu0 %1901 }
 0x9b5   : > { %5741 = vst [vmem:[#allocation2_spill] sm:$0xff] %v5255_v16  ;;  %v1946_v43 = vpack.c.bf16 %v5255_v16, %v5252_v32  ;;  %v5261_v19 = vsub.f32 %v5057_v54, %v1902_v7 }
 0x9b6   : > { %v1904_v28 = vpop.permute.xlu1 %1903 }
 0x9b7   : > { %5742 = vst [vmem:[#allocation3_spill] sm:$0xff] %v5261_v19  ;;  %v5264_v4 = vsub.f32 %v5060_v55, %v1904_v28  ;;  %4519 = vmatmul.mubr.msk.bf16.gmra.mrb[88].mxu0 %vm212_vm0, %v1946_v43  ;;  %v4729_v55 = vld [vmem:[%s5733_s1 + $0x98] sm:$0xff]  }
 0x9b8   : > { %v1906_v47 = vpop.permute.xlu0 %1905  ;;  %4546 = vmatprep.subr.bf16.mxu0 %v4729_v55 }
 0x9b9   : > { %5743 = vst [vmem:[#allocation4_spill] sm:$0xff] %v5264_v4  ;;  %v1947_v49 = vpack.c.bf16 %v5264_v4, %v5261_v19  ;;  %v5270_v26 = vsub.f32 %v5066_v58, %v1906_v47  ;;  %4547 = vmatpush3.bf16.msra.mxu0 %v4729_v55  ;;  %v3981_v58 = vld [vmem:[%s5734_s2 + $0x8] ss:$0 sm:$0xff] }
 0x9ba   : > { %v1908_v31 = vpop.permute.xlu1 %1907  ;;  %4548 = vmatprep.subr.bf16.mxu0 %v4730_v27 }
 0x9bb   : > { %5744 = vst [vmem:[#allocation5_spill] sm:$0xff] %v5270_v26  ;;  %v5273_v9 = vsub.f32 %v5069_v62, %v1908_v31  ;;  %4522 = vmatprep.mubr.msk.bf16.mxu0 %vm212_vm0, %v1947_v49 }
 0x9bd   : > { %5745 = vst [vmem:[#allocation6_spill] sm:$0xff] %v5273_v9  ;;  %v1948_v54 = vpack.c.bf16 %v5273_v9, %v5270_v26  ;;  %4549 = vmatpush3.bf16.msra.mxu0 %v4730_v27 }
 0x9bf   : > { %4523 = vmatmul.mubr.msk.bf16.gmra.mrb[92].mxu0 %vm212_vm0, %v1948_v54 }
 0xa79   : > { %v4512_v62 = vpop.f32.mrb[80].mxu0 }
 0xa7a   : > { %v2031_v1 = vadd.f32 %v4512_v62, %v3981_v58  ;;  %v2022_v35 = vpop.f32.mrb[81].mxu0 }
 0xa7b   : > { %v2023_v37 = vadd.f32 %v3981_v58, %v2022_v35  ;;  %v4513_v38 = vpop.f32.mrb[82].mxu0 }
 0xa7c   : > { %v2034_v22 = vadd.f32 %v4513_v38, %v3981_v58  ;;  %v2025_v7 = vpop.f32.mrb[83].mxu0  ;;  %v2087_v28 = vmax.f32 %v2031_v1, 0.0 }
 0xa7d   : > { %v2026_v43 = vadd.f32 %v3981_v58, %v2025_v7  ;;  %v2085_v49 = vmax.f32 %v2023_v37, 0.0 }
 0xa7e   : > { %v2088_v47 = vmax.f32 %v2034_v22, 0.0 }
 0xa7f   : > { %v2086_v31 = vmax.f32 %v2026_v43, 0.0 }
 0xa80   : > { %v2102_v54 = vpack.c.bf16 %v2088_v47, %v2087_v28 }
 0xa81   : > { %v2101_v55 = vpack.c.bf16 %v2086_v31, %v2085_v49 }
 0xa82   : > { %v4516_v9 = vpop.f32.mrb[84].mxu0 }
 0xa83   : > { %v2047_v27 = vadd.f32 %v4516_v9, %v3981_v58  ;;  %v2038_v26 = vpop.f32.mrb[85].mxu0  ;;  %4530 = vmatprep.mubr.msk.bf16.mxu1 %vm379_vm1, %v2101_v55 }
 0xa84   : > { %v2039_v4 = vadd.f32 %v3981_v58, %v2038_v26  ;;  %v4517_v19 = vpop.f32.mrb[86].mxu0  ;;  %4531 = vmatmul.mubr.msk.bf16.vlgmr.msra.gmra.mrb[80].mxu1 %vm379_vm1, %v2102_v54 }
 0xa85   : > { %v2050_v62 = vadd.f32 %v4517_v19, %v3981_v58  ;;  %v2041_v35 = vpop.f32.mrb[87].mxu0  ;;  %v2091_v16 = vmax.f32 %v2047_v27, 0.0 }
 0xa86   : > { %v2042_v38 = vadd.f32 %v3981_v58, %v2041_v35  ;;  %v2089_v1 = vmax.f32 %v2039_v4, 0.0 }
 0xa87   : > { %v2092_v7 = vmax.f32 %v2050_v62, 0.0 }
 0xa88   : > { %v2090_v22 = vmax.f32 %v2042_v38, 0.0 }
 0xa89   : > { %v2104_v37 = vpack.c.bf16 %v2092_v7, %v2091_v16 }
 0xa8a   : > { %v2103_v43 = vpack.c.bf16 %v2090_v22, %v2089_v1  ;;  %v4520_v28 = vpop.f32.mrb[88].mxu0 }
 0xa8b   : > { %v2063_v47 = vadd.f32 %v4520_v28, %v3981_v58  ;;  %v2054_v49 = vpop.f32.mrb[89].mxu0 }
 0xa8c   : > { %v2055_v9 = vadd.f32 %v3981_v58, %v2054_v49  ;;  %v4521_v31 = vpop.f32.mrb[90].mxu0  ;;  %4534 = vmatprep.mubr.msk.bf16.mxu1 %vm379_vm1, %v2103_v43 }
 0xa8d   : > { %v2066_v26 = vadd.f32 %v4521_v31, %v3981_v58  ;;  %v2057_v55 = vpop.f32.mrb[91].mxu0  ;;  %4535 = vmatmul.mubr.msk.bf16.gmra.mrb[84].mxu1 %vm379_vm1, %v2104_v37  ;;  %v2095_v54 = vmax.f32 %v2063_v47, 0.0 }
 0xa8e   : > { %v2058_v19 = vadd.f32 %v3981_v58, %v2057_v55  ;;  %v2093_v27 = vmax.f32 %v2055_v9, 0.0 }
 0xa8f   : > { %v2096_v35 = vmax.f32 %v2066_v26, 0.0 }
 0xa90   : > { %v2094_v62 = vmax.f32 %v2058_v19, 0.0 }
 0xa91   : > { %v2106_v4 = vpack.c.bf16 %v2096_v35, %v2095_v54  ;;  %v4731_v54 = vld [vmem:[%s5733_s1 + $0xa8] sm:$0xff]   ;;  %v4732_v35 = vld [vmem:[%s5733_s1 + $0xb0] sm:$0xff]  }
 0xa92   : > { %v2105_v38 = vpack.c.bf16 %v2094_v62, %v2093_v27  ;;  %v4524_v16 = vpop.f32.mrb[92].mxu0  ;;  %4566 = vmatprep.subr.bf16.mxu1 %v4731_v54 }
 0xa93   : > { %v2079_v7 = vadd.f32 %v4524_v16, %v3981_v58  ;;  %v2070_v1 = vpop.f32.mrb[93].mxu0  ;;  %4567 = vmatpush3.bf16.msra.mxu1 %v4731_v54 }
 0xa94   : > { %v2071_v22 = vadd.f32 %v3981_v58, %v2070_v1  ;;  %v4525_v28 = vpop.f32.mrb[94].mxu0  ;;  %4538 = vmatprep.mubr.msk.bf16.mxu1 %vm379_vm1, %v2105_v38  ;;  %4568 = vmatprep.subr.bf16.mxu1 %v4732_v35 }
 0xa95   : > { %v2082_v49 = vadd.f32 %v4525_v28, %v3981_v58  ;;  %v2073_v43 = vpop.f32.mrb[95].mxu0  ;;  %4539 = vmatmul.mubr.msk.bf16.gmra.mrb[88].mxu1 %vm379_vm1, %v2106_v4  ;;  %v2099_v37 = vmax.f32 %v2079_v7, 0.0 }
 0xa96   : > { %v2074_v31 = vadd.f32 %v3981_v58, %v2073_v43  ;;  %v2097_v47 = vmax.f32 %v2071_v22, 0.0  ;;  %v3996_v58 = vld [vmem:[%s5734_s2 + $0x9] ss:$0 sm:$0xff] }
 0xa97   : > { %v2100_v55 = vmax.f32 %v2082_v49, 0.0  ;;  %4569 = vmatpush3.bf16.msra.mxu1 %v4732_v35 }
 0xa98   : > { %v2098_v26 = vmax.f32 %v2074_v31, 0.0 }
 0xa99   : > { %v2108_v9 = vpack.c.bf16 %v2100_v55, %v2099_v37 }
 0xa9a   : > { %v2107_v19 = vpack.c.bf16 %v2098_v26, %v2097_v47 }
 0xa9c   : > { %4542 = vmatprep.mubr.msk.bf16.mxu1 %vm379_vm1, %v2107_v19 }
 0xa9d   : > { %4543 = vmatmul.mubr.msk.bf16.gmra.mrb[92].mxu1 %vm379_vm1, %v2108_v9 }
 0xb57   : > { %v4532_v27 = vpop.f32.mrb[80].mxu1 }
 0xb58   : > { %v2197_v62 = vadd.f32 %v4532_v27, %v3996_v58  ;;  %v2188_v4 = vpop.f32.mrb[81].mxu1 }
 0xb59   : > { %v2189_v38 = vadd.f32 %v3996_v58, %v2188_v4  ;;  %v4533_v16 = vpop.f32.mrb[82].mxu1 }
 0xb5a   : > { %v2200_v7 = vadd.f32 %v4533_v16, %v3996_v58  ;;  %v2191_v1 = vpop.f32.mrb[83].mxu1  ;;  %v2253_v28 = vmax.f32 %v2197_v62, 0.0 }
 0xb5b   : > { %v2192_v22 = vadd.f32 %v3996_v58, %v2191_v1  ;;  %v2251_v43 = vmax.f32 %v2189_v38, 0.0 }
 0xb5c   : > { %v2254_v49 = vmax.f32 %v2200_v7, 0.0 }
 0xb5d   : > { %v2252_v31 = vmax.f32 %v2192_v22, 0.0 }
 0xb5e   : > { %v2268_v37 = vpack.c.bf16 %v2254_v49, %v2253_v28 }
 0xb5f   : > { %v2267_v55 = vpack.c.bf16 %v2252_v31, %v2251_v43 }
 0xb60   : > { %v4536_v47 = vpop.f32.mrb[84].mxu1 }
 0xb61   : > { %v2213_v26 = vadd.f32 %v4536_v47, %v3996_v58  ;;  %v2204_v9 = vpop.f32.mrb[85].mxu1  ;;  %4550 = vmatprep.mubr.msk.bf16.mxu0 %vm379_vm1, %v2267_v55 }
 0xb62   : > { %v2205_v19 = vadd.f32 %v3996_v58, %v2204_v9  ;;  %v4537_v54 = vpop.f32.mrb[86].mxu1  ;;  %4551 = vmatmul.mubr.msk.bf16.vlgmr.msra.gmra.mrb[96].mxu0 %vm379_vm1, %v2268_v37 }
 0xb63   : > { %v2216_v35 = vadd.f32 %v4537_v54, %v3996_v58  ;;  %v2207_v27 = vpop.f32.mrb[87].mxu1  ;;  %v2257_v16 = vmax.f32 %v2213_v26, 0.0 }
 0xb64   : > { %v2208_v4 = vadd.f32 %v3996_v58, %v2207_v27  ;;  %v2255_v62 = vmax.f32 %v2205_v19, 0.0 }
 0xb65   : > { %v2258_v1 = vmax.f32 %v2216_v35, 0.0 }
 0xb66   : > { %v2256_v7 = vmax.f32 %v2208_v4, 0.0 }
 0xb67   : > { %v2270_v38 = vpack.c.bf16 %v2258_v1, %v2257_v16 }
 0xb68   : > { %v2269_v22 = vpack.c.bf16 %v2256_v7, %v2255_v62  ;;  %v4540_v28 = vpop.f32.mrb[88].mxu1 }
 0xb69   : > { %v2229_v49 = vadd.f32 %v4540_v28, %v3996_v58  ;;  %v2220_v43 = vpop.f32.mrb[89].mxu1 }
 0xb6a   : > { %v2221_v31 = vadd.f32 %v3996_v58, %v2220_v43  ;;  %v4541_v47 = vpop.f32.mrb[90].mxu1  ;;  %4554 = vmatprep.mubr.msk.bf16.mxu0 %vm379_vm1, %v2269_v22 }
 0xb6b   : > { %v2232_v55 = vadd.f32 %v4541_v47, %v3996_v58  ;;  %v2223_v9 = vpop.f32.mrb[91].mxu1  ;;  %4555 = vmatmul.mubr.msk.bf16.gmra.mrb[100].mxu0 %vm379_vm1, %v2270_v38  ;;  %v2261_v54 = vmax.f32 %v2229_v49, 0.0 }
 0xb6c   : > { %v2224_v37 = vadd.f32 %v3996_v58, %v2223_v9  ;;  %v2259_v26 = vmax.f32 %v2221_v31, 0.0 }
 0xb6d   : > { %v2262_v27 = vmax.f32 %v2232_v55, 0.0 }
 0xb6e   : > { %v2260_v35 = vmax.f32 %v2224_v37, 0.0 }
 0xb6f   : > { %v2272_v19 = vpack.c.bf16 %v2262_v27, %v2261_v54  ;;  %v4733_v54 = vld [vmem:[%s5733_s1 + $0xb8] sm:$0xff]  }
 0xb70   : > { %v2271_v4 = vpack.c.bf16 %v2260_v35, %v2259_v26  ;;  %v4544_v16 = vpop.f32.mrb[92].mxu1  ;;  %4586 = vmatprep.subr.bf16.mxu0 %v4733_v54 }
 0xb71   : > { %v2245_v1 = vadd.f32 %v4544_v16, %v3996_v58  ;;  %v2236_v62 = vpop.f32.mrb[93].mxu1  ;;  %4587 = vmatpush3.bf16.msra.mxu0 %v4733_v54 }
 0xb72   : > { %v2237_v7 = vadd.f32 %v3996_v58, %v2236_v62  ;;  %v4545_v28 = vpop.f32.mrb[94].mxu1  ;;  %4558 = vmatprep.mubr.msk.bf16.mxu0 %vm379_vm1, %v2271_v4 }
 0xb73   : > { %v2248_v43 = vadd.f32 %v4545_v28, %v3996_v58  ;;  %v2239_v22 = vpop.f32.mrb[95].mxu1  ;;  %4559 = vmatmul.mubr.msk.bf16.gmra.mrb[104].mxu0 %vm379_vm1, %v2272_v19  ;;  %v2265_v38 = vmax.f32 %v2245_v1, 0.0 }
 0xb74   : > { %v2240_v47 = vadd.f32 %v3996_v58, %v2239_v22  ;;  %v2263_v49 = vmax.f32 %v2237_v7, 0.0  ;;  %v4012_v58 = vld [vmem:[%s5734_s2 + $0xa] ss:$0 sm:$0xff] }
 0xb75   : > { %v2266_v9 = vmax.f32 %v2248_v43, 0.0 }
 0xb76   : > { %v2264_v55 = vmax.f32 %v2240_v47, 0.0 }
 0xb77   : > { %v2274_v31 = vpack.c.bf16 %v2266_v9, %v2265_v38 }
 0xb78   : > { %v2273_v37 = vpack.c.bf16 %v2264_v55, %v2263_v49 }
 0xb7a   : > { %4562 = vmatprep.mubr.msk.bf16.mxu0 %vm379_vm1, %v2273_v37 }
 0xb7b   : > { %4563 = vmatmul.mubr.msk.bf16.gmra.mrb[108].mxu0 %vm379_vm1, %v2274_v31 }
 0xc35   : > { %v4552_v27 = vpop.f32.mrb[96].mxu0 }
 0xc36   : > { %v2363_v26 = vadd.f32 %v4552_v27, %v4012_v58  ;;  %v2354_v35 = vpop.f32.mrb[97].mxu0 }
 0xc37   : > { %v2355_v19 = vadd.f32 %v4012_v58, %v2354_v35  ;;  %v4553_v4 = vpop.f32.mrb[98].mxu0 }
 0xc38   : > { %v2366_v16 = vadd.f32 %v4553_v4, %v4012_v58  ;;  %v2357_v1 = vpop.f32.mrb[99].mxu0  ;;  %v2419_v7 = vmax.f32 %v2363_v26, 0.0 }
 0xc39   : > { %v2358_v62 = vadd.f32 %v4012_v58, %v2357_v1  ;;  %v2417_v43 = vmax.f32 %v2355_v19, 0.0 }
 0xc3a   : > { %v2420_v28 = vmax.f32 %v2366_v16, 0.0 }
 0xc3b   : > { %v2418_v22 = vmax.f32 %v2358_v62, 0.0 }
 0xc3c   : > { %v2434_v47 = vpack.c.bf16 %v2420_v28, %v2419_v7 }
 0xc3d   : > { %v2433_v38 = vpack.c.bf16 %v2418_v22, %v2417_v43 }
 0xc3e   : > { %v4556_v9 = vpop.f32.mrb[100].mxu0 }
 0xc3f   : > { %v2379_v49 = vadd.f32 %v4556_v9, %v4012_v58  ;;  %v2370_v55 = vpop.f32.mrb[101].mxu0  ;;  %4570 = vmatprep.mubr.msk.bf16.mxu1 %vm379_vm1, %v2433_v38 }
 0xc40   : > { %v2371_v31 = vadd.f32 %v4012_v58, %v2370_v55  ;;  %v4557_v37 = vpop.f32.mrb[102].mxu0  ;;  %4571 = vmatmul.mubr.msk.bf16.vlgmr.msra.gmra.mrb[96].mxu1 %vm379_vm1, %v2434_v47 }
 0xc41   : > { %v2382_v54 = vadd.f32 %v4557_v37, %v4012_v58  ;;  %v2373_v27 = vpop.f32.mrb[103].mxu0  ;;  %v2423_v4 = vmax.f32 %v2379_v49, 0.0 }
 0xc42   : > { %v2374_v35 = vadd.f32 %v4012_v58, %v2373_v27  ;;  %v2421_v26 = vmax.f32 %v2371_v31, 0.0 }
 0xc43   : > { %v2424_v1 = vmax.f32 %v2382_v54, 0.0 }
 0xc44   : > { %v2422_v16 = vmax.f32 %v2374_v35, 0.0 }
 0xc45   : > { %v2436_v19 = vpack.c.bf16 %v2424_v1, %v2423_v4 }
 0xc46   : > { %v2435_v62 = vpack.c.bf16 %v2422_v16, %v2421_v26  ;;  %v4560_v7 = vpop.f32.mrb[104].mxu0 }
 0xc47   : > { %v2395_v28 = vadd.f32 %v4560_v7, %v4012_v58  ;;  %v2386_v43 = vpop.f32.mrb[105].mxu0 }
 0xc48   : > { %v2387_v22 = vadd.f32 %v4012_v58, %v2386_v43  ;;  %v4561_v9 = vpop.f32.mrb[106].mxu0  ;;  %4574 = vmatprep.mubr.msk.bf16.mxu1 %vm379_vm1, %v2435_v62 }
 0xc49   : > { %v2398_v38 = vadd.f32 %v4561_v9, %v4012_v58  ;;  %v2389_v55 = vpop.f32.mrb[107].mxu0  ;;  %4575 = vmatmul.mubr.msk.bf16.gmra.mrb[100].mxu1 %vm379_vm1, %v2436_v19  ;;  %v2427_v37 = vmax.f32 %v2395_v28, 0.0 }
 0xc4a   : > { %v2390_v47 = vadd.f32 %v4012_v58, %v2389_v55  ;;  %v2425_v49 = vmax.f32 %v2387_v22, 0.0 }
 0xc4b   : > { %v2428_v27 = vmax.f32 %v2398_v38, 0.0 }
 0xc4c   : > { %v2426_v54 = vmax.f32 %v2390_v47, 0.0 }
 0xc4d   : > { %v2438_v31 = vpack.c.bf16 %v2428_v27, %v2427_v37 }
 0xc4e   : > { %v2437_v35 = vpack.c.bf16 %v2426_v54, %v2425_v49  ;;  %v4564_v4 = vpop.f32.mrb[108].mxu0 }
 0xc4f   : > { %v2411_v1 = vadd.f32 %v4564_v4, %v4012_v58  ;;  %v2402_v26 = vpop.f32.mrb[109].mxu0 }
 0xc50   : > { %v2403_v16 = vadd.f32 %v4012_v58, %v2402_v26  ;;  %v4565_v7 = vpop.f32.mrb[110].mxu0  ;;  %4578 = vmatprep.mubr.msk.bf16.mxu1 %vm379_vm1, %v2437_v35 }
 0xc51   : > { %v2414_v43 = vadd.f32 %v4565_v7, %v4012_v58  ;;  %v2405_v62 = vpop.f32.mrb[111].mxu0  ;;  %4579 = vmatmul.mubr.msk.bf16.gmra.mrb[104].mxu1 %vm379_vm1, %v2438_v31  ;;  %v2431_v19 = vmax.f32 %v2411_v1, 0.0 }
 0xc52   : > { %v2406_v9 = vadd.f32 %v4012_v58, %v2405_v62  ;;  %v2429_v28 = vmax.f32 %v2403_v16, 0.0 }
 0xc53   : > { %v2432_v55 = vmax.f32 %v2414_v43, 0.0 }
 0xc54   : > { %v2430_v38 = vmax.f32 %v2406_v9, 0.0 }
 0xc55   : > { %v2440_v22 = vpack.c.bf16 %v2432_v55, %v2431_v19 }
 0xc56   : > { %v2439_v47 = vpack.c.bf16 %v2430_v38, %v2429_v28 }
 0xc58   : > { %4582 = vmatprep.mubr.msk.bf16.mxu1 %vm379_vm1, %v2439_v47 }
 0xc59   : > { %4583 = vmatmul.mubr.msk.bf16.gmra.mrb[108].mxu1 %vm379_vm1, %v2440_v22 }
 0xd13   : > { %v4572_v37 = vpop.f32.mrb[96].mxu1 }
 0xd14   : > { %v2515_v27 = vpop.f32.mrb[97].mxu1 }
 0xd15   : > { %v4573_v49 = vpop.f32.mrb[98].mxu1 }
 0xd16   : > { %v2579_v54 = vpack.c.bf16 %v4573_v49, %v4572_v37  ;;  %v2518_v35 = vpop.f32.mrb[99].mxu1 }
 0xd17   : > { %v2578_v4 = vpack.c.bf16 %v2518_v35, %v2515_v27  ;;  %v5341_v35 = vld [vmem:[%s5734_s2 + $0xb] ss:$0 sm:$0xff] }
 0xd19   : > { %4588 = vmatprep.mubr.msk.bf16.mxu0 %vm212_vm0, %v2578_v4 }
 0xd1a   : > { %4589 = vmatmul.mubr.msk.bf16.vlgmr.msra.gmra.mrb[112].mxu0 %vm212_vm0, %v2579_v54  ;;  %v4734_v54 = vld [vmem:[%s5733_s1 + $0xc0] sm:$0xff]  }
 0xd1b   : > { %4604 = vmatprep.subr.bf16.mxu1 %v4734_v54 }
 0xd1c   : > { %v4576_v58 = vpop.f32.mrb[100].mxu1  ;;  %4605 = vmatpush3.bf16.msra.mxu1 %v4734_v54 }
 0xd1d   : > { %v2531_v31 = vpop.f32.mrb[101].mxu1 }
 0xd1e   : > { %v4577_v1 = vpop.f32.mrb[102].mxu1 }
 0xd1f   : > { %v2581_v26 = vpack.c.bf16 %v4577_v1, %v4576_v58  ;;  %v2534_v16 = vpop.f32.mrb[103].mxu1  ;;  %v1847_v58 = vadd.f32 %v5143_v40, %v4933_v39  ;;  %v1846_v39 = vadd.f32 %v5139_v36, %v4943_v45 }
 0xd20   : > { %v2580_v7 = vpack.c.bf16 %v2534_v16, %v2531_v31 }
 0xd22   : > { %4592 = vmatprep.mubr.msk.bf16.mxu0 %vm212_vm0, %v2580_v7 }
 0xd23   : > { %4593 = vmatmul.mubr.msk.bf16.gmra.mrb[116].mxu0 %vm212_vm0, %v2581_v26  ;;  %v1845_v26 = vadd.f32 %v5137_v5, %v4935_v41 }
 0xd24   : > { %v4580_v43 = vpop.f32.mrb[104].mxu1 }
 0xd25   : > { %v2547_v62 = vpop.f32.mrb[105].mxu1 }
 0xd26   : > { %v4581_v9 = vpop.f32.mrb[106].mxu1 }
 0xd27   : > { %v2583_v19 = vpack.c.bf16 %v4581_v9, %v4580_v43  ;;  %v2550_v55 = vpop.f32.mrb[107].mxu1  ;;  %v1848_v43 = vadd.f32 %v5147_v6, %v4941_v44  ;;  %v1851_v6 = vadd.f32 %v5159_v13, %v4955_v52  ;;  %v1850_v52 = vadd.f32 %v5155_v12, %v4951_v51 }
 0xd28   : > { %v2582_v28 = vpack.c.bf16 %v2550_v55, %v2547_v62 }
 0xd2a   : > { %4596 = vmatprep.mubr.msk.bf16.mxu0 %vm212_vm0, %v2582_v28  ;;  %v1849_v28 = vadd.f32 %v5153_v11, %v4949_v48 }
 0xd2b   : > { %4597 = vmatmul.mubr.msk.bf16.gmra.mrb[120].mxu0 %vm212_vm0, %v2583_v19 }
 0xd2c   : > { %v4584_v38 = vpop.f32.mrb[108].mxu1 }
 0xd2d   : > { %v2563_v22 = vpop.f32.mrb[109].mxu1 }
 0xd2e   : > { %v4585_v47 = vpop.f32.mrb[110].mxu1 }
 0xd2f   : > { %v2585_v37 = vpack.c.bf16 %v4585_v47, %v4584_v38  ;;  %v2566_v27 = vpop.f32.mrb[111].mxu1  ;;  %v1852_v47 = vadd.f32 %v5163_v50, %v4959_v53  ;;  %v1855_v50 = vadd.f32 %v5175_v23, %v4971_v60  ;;  %v1854_v60 = vadd.f32 %v5171_v63, %v4967_v59 }
 0xd30   : > { %v2584_v49 = vpack.c.bf16 %v2566_v27, %v2563_v22 }
 0xd32   : > { %4600 = vmatprep.mubr.msk.bf16.mxu0 %vm212_vm0, %v2584_v49 }
 0xd33   : > { %4601 = vmatmul.mubr.msk.bf16.gmra.mrb[124].mxu0 %vm212_vm0, %v2585_v37 }
 0xded   : > { %v4590_v4 = vpop.f32.mrb[112].mxu0 }
 0xdee   : > { %v2666_v31 = vadd.f32 %v4590_v4, %v5341_v35  ;;  %v2657_v1 = vpop.f32.mrb[113].mxu0  ;;  %v1853_v4 = vadd.f32 %v5167_v57, %v4963_v56 }
 0xdef   : > { %v2658_v16 = vadd.f32 %v5341_v35, %v2657_v1  ;;  %v4591_v7 = vpop.f32.mrb[114].mxu0  ;;  %v1856_v1 = vadd.f32 %v5179_v0, %v4975_v61  ;;  %v1859_v0 = vadd.f32 %v5197_v34, %v4993_v15  ;;  %v1860_v15 = vadd.f32 %v5201_v3, %v4997_v20 }
 0xdf0   : > { %v5351_v62 = vadd.f32 %v2666_v31, %v1847_v58  ;;  %v2669_v9 = vadd.f32 %v4591_v7, %v5341_v35  ;;  %v2660_v19 = vpop.f32.mrb[115].mxu0 }
 0xdf1   : > { %v5356_v40 = vadd.f32 %v2658_v16, %v1845_v26  ;;  %v2661_v55 = vadd.f32 %v5341_v35, %v2660_v19  ;;  %2752 = vrot.lane.b32.xlu0 %v2658_v16, %s4750_s21  ;;  %v4736_v19 = vld [vmem:[%s5733_s1 + $0xd0] sm:$0xff]  }
 0xdf2   : > { %v5360_v41 = vadd.f32 %v2669_v9, %v1848_v43 }
 0xdf3   : > { %v5362_v5 = vadd.f32 %v2661_v55, %v1846_v39  ;;  %2754 = vrot.lane.b32.xlu1 %v2661_v55, %s4750_s21  ;;  %v1857_v39 = vadd.f32 %v5189_v24, %v4985_v29 }
 0xdf5   : > { %2756 = vrot.lane.b32.xlu0 %v2666_v31, %s4750_s21 }
 0xdf6   : > { %v4594_v44 = vpop.f32.mrb[116].mxu0 }
 0xdf7   : > { %v2682_v45 = vadd.f32 %v4594_v44, %v5341_v35  ;;  %v2673_v36 = vpop.f32.mrb[117].mxu0  ;;  %2758 = vrot.lane.b32.xlu1 %v2669_v9, %s4750_s21  ;;  %v4735_v9 = vld [vmem:[%s5733_s1 + $0xc8] sm:$0xff]  }
 0xdf8   : > { %v2674_v38 = vadd.f32 %v5341_v35, %v2673_v36  ;;  %v4595_v22 = vpop.f32.mrb[118].mxu0  ;;  %4622 = vmatprep.subr.bf16.mxu0 %v4735_v9  ;;  %v1858_v36 = vadd.f32 %v5193_v33, %v4989_v14 }
 0xdf9   : > { %v5375_v37 = vadd.f32 %v2682_v45, %v1851_v6  ;;  %v2685_v27 = vadd.f32 %v4595_v22, %v5341_v35  ;;  %v2676_v49 = vpop.f32.mrb[119].mxu0  ;;  %4623 = vmatpush3.bf16.msra.mxu0 %v4735_v9 }
 0xdfa   : > { %v5380_v13 = vadd.f32 %v2674_v38, %v1849_v28  ;;  %v2677_v54 = vadd.f32 %v5341_v35, %v2676_v49  ;;  %2760 = vrot.lane.b32.xlu0 %v2674_v38, %s4750_s21  ;;  %4624 = vmatprep.subr.bf16.mxu0 %v4736_v19 }
 0xdfb   : > { %v5384_v48 = vadd.f32 %v2685_v27, %v1852_v47 }
 0xdfc   : > { %v5386_v11 = vadd.f32 %v2677_v54, %v1850_v52  ;;  %2762 = vrot.lane.b32.xlu1 %v2677_v54, %s4750_s21 }
 0xdfd   : > { %4625 = vmatpush3.bf16.msra.mxu0 %v4736_v19 }
 0xdfe   : > { %v4598_v53 = vpop.f32.mrb[120].mxu0  ;;  %2764 = vrot.lane.b32.xlu0 %v2682_v45, %s4750_s21 }
 0xdff   : > { %v2698_v51 = vadd.f32 %v4598_v53, %v5341_v35  ;;  %v2689_v12 = vpop.f32.mrb[121].mxu0 }
 0xe00   : > { %v2690_v58 = vadd.f32 %v5341_v35, %v2689_v12  ;;  %v4599_v31 = vpop.f32.mrb[122].mxu0  ;;  %2766 = vrot.lane.b32.xlu1 %v2685_v27, %s4750_s21 }
 0xe01   : > { %v5399_v26 = vadd.f32 %v2698_v51, %v1855_v50  ;;  %v2701_v16 = vadd.f32 %v4599_v31, %v5341_v35  ;;  %v2692_v7 = vpop.f32.mrb[123].mxu0 }
 0xe02   : > { %v5404_v23 = vadd.f32 %v2690_v58, %v1853_v4  ;;  %v2693_v56 = vadd.f32 %v5341_v35, %v2692_v7  ;;  %2768 = vrot.lane.b32.xlu0 %v2690_v58, %s4750_s21  ;;  %v5746_v7 = vld [vmem:[#allocation2_spill] sm:$0xff] }
 0xe03   : > { %v5408_v57 = vadd.f32 %v2701_v16, %v1856_v1 }
 0xe04   : > { %v5410_v43 = vadd.f32 %v2693_v56, %v1854_v60  ;;  %2770 = vrot.lane.b32.xlu1 %v2693_v56, %s4750_s21 }
 0xe06   : > { %2772 = vrot.lane.b32.xlu0 %v2698_v51, %s4750_s21  ;;  %v4602_v61 = vpop.f32.mrb[124].mxu0 }
 0xe07   : > { %v2714_v59 = vadd.f32 %v4602_v61, %v5341_v35  ;;  %v2705_v63 = vpop.f32.mrb[125].mxu0  ;;  %v5747_v61 = vld [vmem:[#allocation3_spill] sm:$0xff] }
 0xe08   : > { %v2706_v55 = vadd.f32 %v5341_v35, %v2705_v63  ;;  %2774 = vrot.lane.b32.xlu1 %v2701_v16, %s4750_s21  ;;  %v4603_v44 = vpop.f32.mrb[126].mxu0 }
 0xe09   : > { %v5429_v34 = vadd.f32 %v2714_v59, %v1859_v0  ;;  %v2717_v6 = vadd.f32 %v4603_v44, %v5341_v35  ;;  %v2708_v45 = vpop.f32.mrb[127].mxu0  ;;  %v5750_v44 = vld [vmem:[#allocation6_spill] sm:$0xff] }
 0xe0a   : > { %v5434_v28 = vadd.f32 %v2706_v55, %v1857_v39  ;;  %v2709_v29 = vadd.f32 %v5341_v35, %v2708_v45  ;;  %2776 = vrot.lane.b32.xlu0 %v2706_v55, %s4750_s21  ;;  %v5749_v39 = vld [vmem:[#allocation5_spill] sm:$0xff] }
 0xe0b   : > { %v5438_v24 = vadd.f32 %v2717_v6, %v1860_v15  ;;  %v4737_v45 = vld [vmem:[%s5733_s1 + $0xd8] sm:$0xff]  }
 0xe0c   : > { %v5440_v20 = vadd.f32 %v2709_v29, %v1858_v36  ;;  %2778 = vrot.lane.b32.xlu1 %v2709_v29, %s4750_s21  ;;  %v4738_v36 = vld [vmem:[%s5733_s1 + $0xe0] sm:$0xff]   ;;  %4642 = vmatprep.subr.bf16.mxu1 %v4737_v45  ;;  %v4053_v29 = vld [vmem:[%s5734_s2 + $0xc] ss:$0 sm:$0xff] }
 0xe0e   : > { %2780 = vrot.lane.b32.xlu0 %v2714_v59, %s4750_s21  ;;  %v5748_v59 = vld [vmem:[#allocation4_spill] sm:$0xff] }
 0xe10   : > { %2782 = vrot.lane.b32.xlu1 %v2717_v6, %s4750_s21 }
 0xe63   : > { %v2753_v14 = vpop.permute.xlu0 %2752 }
 0xe64   : > { %v5446_v3 = vsub.f32 %v5208_v10, %v2753_v14 }
 0xe65   : > { %v2755_v33 = vpop.permute.xlu1 %2754 }
 0xe66   : > { %v5449_v35 = vsub.f32 %v5211_v46, %v2755_v33 }
 0xe67   : > { %v2757_v38 = vpop.permute.xlu0 %2756 }
 0xe68   : > { %v2816_v22 = vpack.c.bf16 %v5449_v35, %v5446_v3  ;;  %v5454_v27 = vsub.f32 %v5216_v17, %v2757_v38 }
 0xe69   : > { %v2759_v47 = vpop.permute.xlu1 %2758 }
 0xe6a   : > { %v5457_v49 = vsub.f32 %v5219_v18, %v2759_v47  ;;  %4606 = vmatprep.mubr.msk.bf16.mxu1 %vm212_vm0, %v2816_v22 }
 0xe6c   : > { %v2817_v10 = vpack.c.bf16 %v5457_v49, %v5454_v27  ;;  %v2761_v52 = vpop.permute.xlu0 %2760 }
 0xe6d   : > { %v5464_v46 = vsub.f32 %v5226_v30, %v2761_v52 }
 0xe6e   : > { %v2763_v54 = vpop.permute.xlu1 %2762  ;;  %4607 = vmatmul.mubr.msk.bf16.vlgmr.msra.gmra.mrb[112].mxu1 %vm212_vm0, %v2817_v10 }
 0xe6f   : > { %v5467_v53 = vsub.f32 %v5229_v8, %v2763_v54  ;;  %4643 = vmatpush3.bf16.msra.mxu1 %v4737_v45 }
 0xe70   : > { %v2765_v17 = vpop.permute.xlu0 %2764  ;;  %4644 = vmatprep.subr.bf16.mxu1 %v4738_v36 }
 0xe71   : > { %v2818_v18 = vpack.c.bf16 %v5467_v53, %v5464_v46  ;;  %v5472_v51 = vsub.f32 %v5234_v21, %v2765_v17 }
 0xe72   : > { %v2767_v50 = vpop.permute.xlu1 %2766 }
 0xe73   : > { %v5475_v12 = vsub.f32 %v5237_v25, %v2767_v50  ;;  %4610 = vmatprep.mubr.msk.bf16.mxu1 %vm212_vm0, %v2818_v18  ;;  %4645 = vmatpush3.bf16.msra.mxu1 %v4738_v36 }
 0xe74   : > { %v2769_v4 = vpop.permute.xlu0 %2768 }
 0xe75   : > { %v2819_v30 = vpack.c.bf16 %v5475_v12, %v5472_v51  ;;  %v5481_v8 = vsub.f32 %v5243_v2, %v2769_v4 }
 0xe76   : > { %v2771_v58 = vpop.permute.xlu1 %2770 }
 0xe77   : > { %v5484_v31 = vsub.f32 %v5246_v42, %v2771_v58  ;;  %4611 = vmatmul.mubr.msk.bf16.gmra.mrb[116].mxu1 %vm212_vm0, %v2819_v30 }
 0xe78   : > { %v2773_v21 = vpop.permute.xlu0 %2772 }
 0xe79   : > { %v2820_v25 = vpack.c.bf16 %v5484_v31, %v5481_v8  ;;  %v5490_v16 = vsub.f32 %v5252_v32, %v2773_v21 }
 0xe7a   : > { %v2775_v1 = vpop.permute.xlu1 %2774 }
 0xe7b   : > { %v5493_v60 = vsub.f32 %v5746_v7, %v2775_v1  ;;  %4614 = vmatprep.mubr.msk.bf16.mxu1 %vm212_vm0, %v2820_v25 }
 0xe7c   : > { %v2777_v2 = vpop.permute.xlu0 %2776 }
 0xe7d   : > { %v2821_v42 = vpack.c.bf16 %v5493_v60, %v5490_v16  ;;  %v5499_v0 = vsub.f32 %v5747_v61, %v2777_v2 }
 0xe7e   : > { %v2779_v56 = vpop.permute.xlu1 %2778 }
 0xe7f   : > { %v5502_v63 = vsub.f32 %v5748_v59, %v2779_v56  ;;  %4615 = vmatmul.mubr.msk.bf16.gmra.mrb[120].mxu1 %vm212_vm0, %v2821_v42 }
 0xe80   : > { %v2781_v32 = vpop.permute.xlu0 %2780 }
 0xe81   : > { %v2822_v9 = vpack.c.bf16 %v5502_v63, %v5499_v0  ;;  %v5508_v55 = vsub.f32 %v5749_v39, %v2781_v32 }
 0xe82   : > { %v2783_v19 = vpop.permute.xlu1 %2782 }
 0xe83   : > { %v5511_v15 = vsub.f32 %v5750_v44, %v2783_v19  ;;  %4618 = vmatprep.mubr.msk.bf16.mxu1 %vm212_vm0, %v2822_v9 }
 0xe85   : > { %v2823_v6 = vpack.c.bf16 %v5511_v15, %v5508_v55 }
 0xe87   : > { %4619 = vmatmul.mubr.msk.bf16.gmra.mrb[124].mxu1 %vm212_vm0, %v2823_v6 }
 0xf41   : > { %v4608_v14 = vpop.f32.mrb[112].mxu1 }
 0xf42   : > { %v2906_v33 = vadd.f32 %v4608_v14, %v4053_v29  ;;  %v2897_v38 = vpop.f32.mrb[113].mxu1 }
 0xf43   : > { %v2898_v22 = vadd.f32 %v4053_v29, %v2897_v38  ;;  %v4609_v47 = vpop.f32.mrb[114].mxu1 }
 0xf44   : > { %v2909_v10 = vadd.f32 %v4609_v47, %v4053_v29  ;;  %v2900_v52 = vpop.f32.mrb[115].mxu1  ;;  %v2962_v17 = vmax.f32 %v2906_v33, 0.0 }
 0xf45   : > { %v2901_v54 = vadd.f32 %v4053_v29, %v2900_v52  ;;  %v2960_v50 = vmax.f32 %v2898_v22, 0.0 }
 0xf46   : > { %v2963_v18 = vmax.f32 %v2909_v10, 0.0 }
 0xf47   : > { %v2961_v4 = vmax.f32 %v2901_v54, 0.0 }
 0xf48   : > { %v2977_v30 = vpack.c.bf16 %v2963_v18, %v2962_v17 }
 0xf49   : > { %v2976_v58 = vpack.c.bf16 %v2961_v4, %v2960_v50 }
 0xf4a   : > { %v4612_v21 = vpop.f32.mrb[116].mxu1 }
 0xf4b   : > { %v2922_v25 = vadd.f32 %v4612_v21, %v4053_v29  ;;  %v2913_v1 = vpop.f32.mrb[117].mxu1  ;;  %4626 = vmatprep.mubr.msk.bf16.mxu0 %vm379_vm1, %v2976_v58 }
 0xf4c   : > { %v2914_v7 = vadd.f32 %v4053_v29, %v2913_v1  ;;  %v4613_v2 = vpop.f32.mrb[118].mxu1  ;;  %4627 = vmatmul.mubr.msk.bf16.vlgmr.msra.gmra.mrb[128].mxu0 %vm379_vm1, %v2977_v30 }
 0xf4d   : > { %v2925_v42 = vadd.f32 %v4613_v2, %v4053_v29  ;;  %v2916_v56 = vpop.f32.mrb[119].mxu1  ;;  %v2966_v59 = vmax.f32 %v2922_v25, 0.0 }
 0xf4e   : > { %v2917_v61 = vadd.f32 %v4053_v29, %v2916_v56  ;;  %v2964_v9 = vmax.f32 %v2914_v7, 0.0 }
 0xf4f   : > { %v2967_v32 = vmax.f32 %v2925_v42, 0.0 }
 0xf50   : > { %v2965_v19 = vmax.f32 %v2917_v61, 0.0 }
 0xf51   : > { %v2979_v39 = vpack.c.bf16 %v2967_v32, %v2966_v59 }
 0xf52   : > { %v2978_v44 = vpack.c.bf16 %v2965_v19, %v2964_v9  ;;  %v4616_v6 = vpop.f32.mrb[120].mxu1  ;;  %v4739_v19 = vld [vmem:[%s5733_s1 + $0xe8] sm:$0xff]  }
 0xf53   : > { %v2938_v45 = vadd.f32 %v4616_v6, %v4053_v29  ;;  %v2929_v36 = vpop.f32.mrb[121].mxu1  ;;  %4662 = vmatprep.subr.bf16.mxu0 %v4739_v19 }
 0xf54   : > { %v2930_v14 = vadd.f32 %v4053_v29, %v2929_v36  ;;  %v4617_v33 = vpop.f32.mrb[122].mxu1  ;;  %4630 = vmatprep.mubr.msk.bf16.mxu0 %vm379_vm1, %v2978_v44  ;;  %4663 = vmatpush3.bf16.msra.mxu0 %v4739_v19 }
 0xf55   : > { %v2941_v38 = vadd.f32 %v4617_v33, %v4053_v29  ;;  %v2932_v22 = vpop.f32.mrb[123].mxu1  ;;  %4631 = vmatmul.mubr.msk.bf16.gmra.mrb[132].mxu0 %vm379_vm1, %v2979_v39  ;;  %v2970_v10 = vmax.f32 %v2938_v45, 0.0  ;;  %v4740_v39 = vld [vmem:[%s5733_s1 + $0xf0] sm:$0xff]  }
 0xf56   : > { %v2933_v47 = vadd.f32 %v4053_v29, %v2932_v22  ;;  %v2968_v54 = vmax.f32 %v2930_v14, 0.0  ;;  %4664 = vmatprep.subr.bf16.mxu0 %v4740_v39 }
 0xf57   : > { %v2971_v52 = vmax.f32 %v2941_v38, 0.0 }
 0xf58   : > { %v2969_v17 = vmax.f32 %v2933_v47, 0.0  ;;  %4665 = vmatpush3.bf16.msra.mxu0 %v4740_v39 }
 0xf59   : > { %v2981_v18 = vpack.c.bf16 %v2971_v52, %v2970_v10 }
 0xf5a   : > { %v2980_v50 = vpack.c.bf16 %v2969_v17, %v2968_v54  ;;  %v4620_v4 = vpop.f32.mrb[124].mxu1 }
 0xf5b   : > { %v2954_v30 = vadd.f32 %v4620_v4, %v4053_v29  ;;  %v2945_v58 = vpop.f32.mrb[125].mxu1 }
 0xf5c   : > { %v2946_v21 = vadd.f32 %v4053_v29, %v2945_v58  ;;  %v4621_v25 = vpop.f32.mrb[126].mxu1  ;;  %4634 = vmatprep.mubr.msk.bf16.mxu0 %vm379_vm1, %v2980_v50 }
 0xf5d   : > { %v2957_v1 = vadd.f32 %v4621_v25, %v4053_v29  ;;  %v2948_v7 = vpop.f32.mrb[127].mxu1  ;;  %4635 = vmatmul.mubr.msk.bf16.gmra.mrb[136].mxu0 %vm379_vm1, %v2981_v18  ;;  %v2974_v42 = vmax.f32 %v2954_v30, 0.0 }
 0xf5e   : > { %v2949_v2 = vadd.f32 %v4053_v29, %v2948_v7  ;;  %v2972_v61 = vmax.f32 %v2946_v21, 0.0  ;;  %v4068_v29 = vld [vmem:[%s5734_s2 + $0xd] ss:$0 sm:$0xff] }
 0xf5f   : > { %v2975_v56 = vmax.f32 %v2957_v1, 0.0 }
 0xf60   : > { %v2973_v59 = vmax.f32 %v2949_v2, 0.0 }
 0xf61   : > { %v2983_v32 = vpack.c.bf16 %v2975_v56, %v2974_v42 }
 0xf62   : > { %v2982_v9 = vpack.c.bf16 %v2973_v59, %v2972_v61 }
 0xf64   : > { %4638 = vmatprep.mubr.msk.bf16.mxu0 %vm379_vm1, %v2982_v9 }
 0xf65   : > { %4639 = vmatmul.mubr.msk.bf16.gmra.mrb[140].mxu0 %vm379_vm1, %v2983_v32 }
0x101f   : > { %v4628_v44 = vpop.f32.mrb[128].mxu0 }
0x1020   : > { %v3072_v6 = vadd.f32 %v4628_v44, %v4068_v29  ;;  %v3063_v45 = vpop.f32.mrb[129].mxu0 }
0x1021   : > { %v3064_v36 = vadd.f32 %v4068_v29, %v3063_v45  ;;  %v4629_v14 = vpop.f32.mrb[130].mxu0 }
0x1022   : > { %v3075_v33 = vadd.f32 %v4629_v14, %v4068_v29  ;;  %v3066_v38 = vpop.f32.mrb[131].mxu0  ;;  %v3128_v47 = vmax.f32 %v3072_v6, 0.0 }
0x1023   : > { %v3067_v22 = vadd.f32 %v4068_v29, %v3066_v38  ;;  %v3126_v52 = vmax.f32 %v3064_v36, 0.0 }
0x1024   : > { %v3129_v10 = vmax.f32 %v3075_v33, 0.0 }
0x1025   : > { %v3127_v54 = vmax.f32 %v3067_v22, 0.0 }
0x1026   : > { %v3143_v17 = vpack.c.bf16 %v3129_v10, %v3128_v47 }
0x1027   : > { %v3142_v18 = vpack.c.bf16 %v3127_v54, %v3126_v52 }
0x1028   : > { %v4632_v50 = vpop.f32.mrb[132].mxu0 }
0x1029   : > { %v3088_v4 = vadd.f32 %v4632_v50, %v4068_v29  ;;  %v3079_v30 = vpop.f32.mrb[133].mxu0  ;;  %4646 = vmatprep.mubr.msk.bf16.mxu1 %vm379_vm1, %v3142_v18 }
0x102a   : > { %v3080_v58 = vadd.f32 %v4068_v29, %v3079_v30  ;;  %v4633_v21 = vpop.f32.mrb[134].mxu0  ;;  %4647 = vmatmul.mubr.msk.bf16.vlgmr.msra.gmra.mrb[128].mxu1 %vm379_vm1, %v3143_v17 }
0x102b   : > { %v3091_v25 = vadd.f32 %v4633_v21, %v4068_v29  ;;  %v3082_v1 = vpop.f32.mrb[135].mxu0  ;;  %v3132_v2 = vmax.f32 %v3088_v4, 0.0 }
0x102c   : > { %v3083_v7 = vadd.f32 %v4068_v29, %v3082_v1  ;;  %v3130_v56 = vmax.f32 %v3080_v58, 0.0 }
0x102d   : > { %v3133_v42 = vmax.f32 %v3091_v25, 0.0 }
0x102e   : > { %v3131_v61 = vmax.f32 %v3083_v7, 0.0 }
0x102f   : > { %v3145_v59 = vpack.c.bf16 %v3133_v42, %v3132_v2 }
0x1030   : > { %v3144_v32 = vpack.c.bf16 %v3131_v61, %v3130_v56  ;;  %v4636_v9 = vpop.f32.mrb[136].mxu0  ;;  %v4741_v61 = vld [vmem:[%s5733_s1 + $0xf8] sm:$0xff]  }
0x1031   : > { %v3104_v19 = vadd.f32 %v4636_v9, %v4068_v29  ;;  %v3095_v39 = vpop.f32.mrb[137].mxu0  ;;  %4682 = vmatprep.subr.bf16.mxu1 %v4741_v61 }
0x1032   : > { %v3096_v44 = vadd.f32 %v4068_v29, %v3095_v39  ;;  %v4637_v6 = vpop.f32.mrb[138].mxu0  ;;  %4650 = vmatprep.mubr.msk.bf16.mxu1 %vm379_vm1, %v3144_v32  ;;  %4683 = vmatpush3.bf16.msra.mxu1 %v4741_v61 }
0x1033   : > { %v3107_v45 = vadd.f32 %v4637_v6, %v4068_v29  ;;  %v3098_v36 = vpop.f32.mrb[139].mxu0  ;;  %4651 = vmatmul.mubr.msk.bf16.gmra.mrb[132].mxu1 %vm379_vm1, %v3145_v59  ;;  %v3136_v33 = vmax.f32 %v3104_v19, 0.0 }
0x1034   : > { %v3099_v14 = vadd.f32 %v4068_v29, %v3098_v36  ;;  %v3134_v22 = vmax.f32 %v3096_v44, 0.0 }
0x1035   : > { %v3137_v38 = vmax.f32 %v3107_v45, 0.0 }
0x1036   : > { %v3135_v47 = vmax.f32 %v3099_v14, 0.0 }
0x1037   : > { %v3147_v10 = vpack.c.bf16 %v3137_v38, %v3136_v33 }
0x1038   : > { %v3146_v52 = vpack.c.bf16 %v3135_v47, %v3134_v22  ;;  %v4640_v54 = vpop.f32.mrb[140].mxu0 }
0x1039   : > { %v3120_v17 = vadd.f32 %v4640_v54, %v4068_v29  ;;  %v3111_v18 = vpop.f32.mrb[141].mxu0 }
0x103a   : > { %v3112_v50 = vadd.f32 %v4068_v29, %v3111_v18  ;;  %v4641_v4 = vpop.f32.mrb[142].mxu0  ;;  %4654 = vmatprep.mubr.msk.bf16.mxu1 %vm379_vm1, %v3146_v52 }
0x103b   : > { %v3123_v30 = vadd.f32 %v4641_v4, %v4068_v29  ;;  %v3114_v58 = vpop.f32.mrb[143].mxu0  ;;  %4655 = vmatmul.mubr.msk.bf16.gmra.mrb[136].mxu1 %vm379_vm1, %v3147_v10  ;;  %v3140_v25 = vmax.f32 %v3120_v17, 0.0 }
0x103c   : > { %v3115_v21 = vadd.f32 %v4068_v29, %v3114_v58  ;;  %v3138_v7 = vmax.f32 %v3112_v50, 0.0  ;;  %v4084_v29 = vld [vmem:[%s5734_s2 + $0xe] ss:$0 sm:$0xff] }
0x103d   : > { %v3141_v1 = vmax.f32 %v3123_v30, 0.0 }
0x103e   : > { %v3139_v2 = vmax.f32 %v3115_v21, 0.0 }
0x103f   : > { %v3149_v42 = vpack.c.bf16 %v3141_v1, %v3140_v25 }
0x1040   : > { %v3148_v56 = vpack.c.bf16 %v3139_v2, %v3138_v7 }
0x1042   : > { %4658 = vmatprep.mubr.msk.bf16.mxu1 %vm379_vm1, %v3148_v56 }
0x1043   : > { %4659 = vmatmul.mubr.msk.bf16.gmra.mrb[140].mxu1 %vm379_vm1, %v3149_v42 }
0x10fd   : > { %v4648_v59 = vpop.f32.mrb[128].mxu1 }
0x10fe   : > { %v3238_v32 = vadd.f32 %v4648_v59, %v4084_v29  ;;  %v3229_v9 = vpop.f32.mrb[129].mxu1 }
0x10ff   : > { %v3230_v19 = vadd.f32 %v4084_v29, %v3229_v9  ;;  %v4649_v39 = vpop.f32.mrb[130].mxu1 }
0x1100   : > { %v3241_v44 = vadd.f32 %v4649_v39, %v4084_v29  ;;  %v3232_v6 = vpop.f32.mrb[131].mxu1  ;;  %v3294_v36 = vmax.f32 %v3238_v32, 0.0 }
0x1101   : > { %v3233_v45 = vadd.f32 %v4084_v29, %v3232_v6  ;;  %v3292_v33 = vmax.f32 %v3230_v19, 0.0 }
0x1102   : > { %v3295_v14 = vmax.f32 %v3241_v44, 0.0 }
0x1103   : > { %v3293_v38 = vmax.f32 %v3233_v45, 0.0 }
0x1104   : > { %v3309_v22 = vpack.c.bf16 %v3295_v14, %v3294_v36 }
0x1105   : > { %v3308_v47 = vpack.c.bf16 %v3293_v38, %v3292_v33 }
0x1106   : > { %v4652_v10 = vpop.f32.mrb[132].mxu1 }
0x1107   : > { %v3254_v52 = vadd.f32 %v4652_v10, %v4084_v29  ;;  %v3245_v54 = vpop.f32.mrb[133].mxu1  ;;  %4666 = vmatprep.mubr.msk.bf16.mxu0 %vm379_vm1, %v3308_v47 }
0x1108   : > { %v3246_v17 = vadd.f32 %v4084_v29, %v3245_v54  ;;  %v4653_v18 = vpop.f32.mrb[134].mxu1  ;;  %4667 = vmatmul.mubr.msk.bf16.vlgmr.msra.gmra.mrb[144].mxu0 %vm379_vm1, %v3309_v22 }
0x1109   : > { %v3257_v50 = vadd.f32 %v4653_v18, %v4084_v29  ;;  %v3248_v4 = vpop.f32.mrb[135].mxu1  ;;  %v3298_v58 = vmax.f32 %v3254_v52, 0.0 }
0x110a   : > { %v3249_v30 = vadd.f32 %v4084_v29, %v3248_v4  ;;  %v3296_v25 = vmax.f32 %v3246_v17, 0.0 }
0x110b   : > { %v3299_v21 = vmax.f32 %v3257_v50, 0.0 }
0x110c   : > { %v3297_v1 = vmax.f32 %v3249_v30, 0.0 }
0x110d   : > { %v3311_v7 = vpack.c.bf16 %v3299_v21, %v3298_v58 }
0x110e   : > { %v3310_v2 = vpack.c.bf16 %v3297_v1, %v3296_v25  ;;  %v4656_v42 = vpop.f32.mrb[136].mxu1 }
0x110f   : > { %v3270_v56 = vadd.f32 %v4656_v42, %v4084_v29  ;;  %v3261_v61 = vpop.f32.mrb[137].mxu1 }
0x1110   : > { %v3262_v59 = vadd.f32 %v4084_v29, %v3261_v61  ;;  %v4657_v32 = vpop.f32.mrb[138].mxu1  ;;  %4670 = vmatprep.mubr.msk.bf16.mxu0 %vm379_vm1, %v3310_v2 }
0x1111   : > { %v3273_v9 = vadd.f32 %v4657_v32, %v4084_v29  ;;  %v3264_v19 = vpop.f32.mrb[139].mxu1  ;;  %4671 = vmatmul.mubr.msk.bf16.gmra.mrb[148].mxu0 %vm379_vm1, %v3311_v7  ;;  %v3302_v44 = vmax.f32 %v3270_v56, 0.0 }
0x1112   : > { %v3265_v39 = vadd.f32 %v4084_v29, %v3264_v19  ;;  %v3300_v45 = vmax.f32 %v3262_v59, 0.0 }
0x1113   : > { %v3303_v6 = vmax.f32 %v3273_v9, 0.0 }
0x1114   : > { %v3301_v36 = vmax.f32 %v3265_v39, 0.0 }
0x1115   : > { %v3313_v14 = vpack.c.bf16 %v3303_v6, %v3302_v44 }
0x1116   : > { %v3312_v33 = vpack.c.bf16 %v3301_v36, %v3300_v45  ;;  %v4660_v38 = vpop.f32.mrb[140].mxu1 }
0x1117   : > { %v3286_v22 = vadd.f32 %v4660_v38, %v4084_v29  ;;  %v3277_v47 = vpop.f32.mrb[141].mxu1 }
0x1118   : > { %v3278_v10 = vadd.f32 %v4084_v29, %v3277_v47  ;;  %v4661_v52 = vpop.f32.mrb[142].mxu1  ;;  %4674 = vmatprep.mubr.msk.bf16.mxu0 %vm379_vm1, %v3312_v33 }
0x1119   : > { %v3289_v54 = vadd.f32 %v4661_v52, %v4084_v29  ;;  %v3280_v17 = vpop.f32.mrb[143].mxu1  ;;  %4675 = vmatmul.mubr.msk.bf16.gmra.mrb[152].mxu0 %vm379_vm1, %v3313_v14  ;;  %v3306_v50 = vmax.f32 %v3286_v22, 0.0 }
0x111a   : > { %v3281_v18 = vadd.f32 %v4084_v29, %v3280_v17  ;;  %v3304_v30 = vmax.f32 %v3278_v10, 0.0  ;;  %v5576_v17 = vld [vmem:[%s5734_s2 + $0xf] ss:$0 sm:$0xff] }
0x111b   : > { %v3307_v4 = vmax.f32 %v3289_v54, 0.0 }
0x111c   : > { %v3305_v58 = vmax.f32 %v3281_v18, 0.0 }
0x111d   : > { %v3315_v21 = vpack.c.bf16 %v3307_v4, %v3306_v50 }
0x111e   : > { %v3314_v25 = vpack.c.bf16 %v3305_v58, %v3304_v30 }
0x1120   : > { %4678 = vmatprep.mubr.msk.bf16.mxu0 %vm379_vm1, %v3314_v25 }
0x1121   : > { %4679 = vmatmul.mubr.msk.bf16.gmra.mrb[156].mxu0 %vm379_vm1, %v3315_v21 }
0x11db   : > { %v4668_v1 = vpop.f32.mrb[144].mxu0 }
0x11dc   : > { %v3390_v7 = vpop.f32.mrb[145].mxu0 }
0x11dd   : > { %v4669_v2 = vpop.f32.mrb[146].mxu0 }
0x11de   : > { %v3454_v42 = vpack.c.bf16 %v4669_v2, %v4668_v1  ;;  %v3393_v56 = vpop.f32.mrb[147].mxu0 }
0x11df   : > { %v3453_v61 = vpack.c.bf16 %v3393_v56, %v3390_v7 }
0x11e1   : > { %4684 = vmatprep.mubr.msk.bf16.mxu1 %vm212_vm0, %v3453_v61 }
0x11e2   : > { %4685 = vmatmul.mubr.msk.bf16.vlgmr.msra.gmra.mrb[144].mxu1 %vm212_vm0, %v3454_v42 }
0x11e4   : > { %v4672_v29 = vpop.f32.mrb[148].mxu0 }
0x11e5   : > { %v3406_v59 = vpop.f32.mrb[149].mxu0 }
0x11e6   : > { %v4673_v32 = vpop.f32.mrb[150].mxu0 }
0x11e7   : > { %v3456_v9 = vpack.c.bf16 %v4673_v32, %v4672_v29  ;;  %v3409_v19 = vpop.f32.mrb[151].mxu0 }
0x11e8   : > { %v3455_v39 = vpack.c.bf16 %v3409_v19, %v3406_v59 }
0x11ea   : > { %4688 = vmatprep.mubr.msk.bf16.mxu1 %vm212_vm0, %v3455_v39 }
0x11eb   : > { %4689 = vmatmul.mubr.msk.bf16.gmra.mrb[148].mxu1 %vm212_vm0, %v3456_v9 }
0x11ec   : > { %v4676_v44 = vpop.f32.mrb[152].mxu0 }
0x11ed   : > { %v3422_v6 = vpop.f32.mrb[153].mxu0 }
0x11ee   : > { %v4677_v45 = vpop.f32.mrb[154].mxu0 }
0x11ef   : > { %v3458_v36 = vpack.c.bf16 %v4677_v45, %v4676_v44  ;;  %v3425_v14 = vpop.f32.mrb[155].mxu0 }
0x11f0   : > { %v3457_v33 = vpack.c.bf16 %v3425_v14, %v3422_v6 }
0x11f2   : > { %4692 = vmatprep.mubr.msk.bf16.mxu1 %vm212_vm0, %v3457_v33 }
0x11f3   : > { %4693 = vmatmul.mubr.msk.bf16.gmra.mrb[152].mxu1 %vm212_vm0, %v3458_v36 }
0x11f4   : > { %v4680_v38 = vpop.f32.mrb[156].mxu0 }
0x11f5   : > { %v3438_v22 = vpop.f32.mrb[157].mxu0 }
0x11f6   : > { %v4681_v47 = vpop.f32.mrb[158].mxu0 }
0x11f7   : > { %v3460_v10 = vpack.c.bf16 %v4681_v47, %v4680_v38  ;;  %v3441_v52 = vpop.f32.mrb[159].mxu0 }
0x11f8   : > { %v3459_v54 = vpack.c.bf16 %v3441_v52, %v3438_v22 }
0x11fa   : > { %4696 = vmatprep.mubr.msk.bf16.mxu1 %vm212_vm0, %v3459_v54 }
0x11fb   : > { %4697 = vmatmul.mubr.msk.bf16.gmra.mrb[156].mxu1 %vm212_vm0, %v3460_v10 }
0x12b5   : > { %v4686_v18 = vpop.f32.mrb[144].mxu1 }
0x12b6   : > { %v3541_v50 = vadd.f32 %v4686_v18, %v5576_v17  ;;  %v3532_v4 = vpop.f32.mrb[145].mxu1 }
0x12b7   : > { %v3533_v30 = vadd.f32 %v5576_v17, %v3532_v4  ;;  %v4687_v58 = vpop.f32.mrb[146].mxu1 }
0x12b8   : > { %v3597_v21 = vadd.f32 %v3541_v50, %v5351_v62  ;;  %v3544_v25 = vadd.f32 %v4687_v58, %v5576_v17  ;;  %3631 = vrot.lane.b32.xlu0 %v3541_v50, %s4750_s21  ;;  %v3535_v1 = vpop.f32.mrb[147].mxu1 }
0x12b9   : > { %v3595_v7 = vadd.f32 %v3533_v30, %v5356_v40  ;;  %v3536_v2 = vadd.f32 %v5576_v17, %v3535_v1 }
0x12ba   : > { %3694 = vst.msk [vmem:[%s5584_s25 + $0x10] sm:$0xff] %vm3691_vm2, %v3597_v21  ;;  %v3598_v42 = vadd.f32 %v3544_v25, %v5360_v41  ;;  %3633 = vrot.lane.b32.xlu1 %v3544_v25, %s4750_s21 }
0x12bb   : > { %3692 = vst.msk [vmem:[%s5584_s25] sm:$0xff] %vm3691_vm2, %v3595_v7  ;;  %v3596_v56 = vadd.f32 %v3536_v2, %v5362_v5 }
0x12bc   : > { %3695 = vst.msk [vmem:[%s5584_s25 + $0x18] sm:$0xff] %vm3691_vm2, %v3598_v42  ;;  %3627 = vrot.lane.b32.xlu0 %v3533_v30, %s4750_s21 }
0x12bd   : > { %3693 = vst.msk [vmem:[%s5584_s25 + $0x8] sm:$0xff] %vm3691_vm2, %v3596_v56 }
0x12be   : > { %v4690_v62 = vpop.f32.mrb[148].mxu1  ;;  %3629 = vrot.lane.b32.xlu1 %v3536_v2, %s4750_s21 }
0x12bf   : > { %v3557_v40 = vadd.f32 %v4690_v62, %v5576_v17  ;;  %v3548_v41 = vpop.f32.mrb[149].mxu1 }
0x12c0   : > { %v3549_v61 = vadd.f32 %v5576_v17, %v3548_v41  ;;  %v4691_v29 = vpop.f32.mrb[150].mxu1 }
0x12c1   : > { %v3601_v5 = vadd.f32 %v3557_v40, %v5375_v37  ;;  %v3560_v59 = vadd.f32 %v4691_v29, %v5576_v17  ;;  %v3551_v32 = vpop.f32.mrb[151].mxu1  ;;  %3639 = vrot.lane.b32.xlu0 %v3557_v40, %s4750_s21 }
0x12c2   : > { %v3599_v9 = vadd.f32 %v3549_v61, %v5380_v13  ;;  %v3552_v19 = vadd.f32 %v5576_v17, %v3551_v32 }
0x12c3   : > { %3698 = vst.msk [vmem:[%s5584_s25 + $0x30] sm:$0xff] %vm3691_vm2, %v3601_v5  ;;  %v3602_v39 = vadd.f32 %v3560_v59, %v5384_v48  ;;  %3641 = vrot.lane.b32.xlu1 %v3560_v59, %s4750_s21 }
0x12c4   : > { %3696 = vst.msk [vmem:[%s5584_s25 + $0x20] sm:$0xff] %vm3691_vm2, %v3599_v9  ;;  %v3600_v44 = vadd.f32 %v3552_v19, %v5386_v11 }
0x12c5   : > { %3699 = vst.msk [vmem:[%s5584_s25 + $0x38] sm:$0xff] %vm3691_vm2, %v3602_v39  ;;  %3635 = vrot.lane.b32.xlu0 %v3549_v61, %s4750_s21 }
0x12c6   : > { %3697 = vst.msk [vmem:[%s5584_s25 + $0x28] sm:$0xff] %vm3691_vm2, %v3600_v44  ;;  %v4694_v37 = vpop.f32.mrb[152].mxu1 }
0x12c7   : > { %v3573_v13 = vadd.f32 %v4694_v37, %v5576_v17  ;;  %v3564_v6 = vpop.f32.mrb[153].mxu1  ;;  %3637 = vrot.lane.b32.xlu1 %v3552_v19, %s4750_s21 }
0x12c8   : > { %v3565_v48 = vadd.f32 %v5576_v17, %v3564_v6  ;;  %v4695_v45 = vpop.f32.mrb[154].mxu1 }
0x12c9   : > { %v3605_v11 = vadd.f32 %v3573_v13, %v5399_v26  ;;  %v3576_v36 = vadd.f32 %v4695_v45, %v5576_v17  ;;  %v3567_v14 = vpop.f32.mrb[155].mxu1  ;;  %3647 = vrot.lane.b32.xlu0 %v3573_v13, %s4750_s21 }
0x12ca   : > { %v3603_v33 = vadd.f32 %v3565_v48, %v5404_v23  ;;  %v3568_v38 = vadd.f32 %v5576_v17, %v3567_v14 }
0x12cb   : > { %3702 = vst.msk [vmem:[%s5584_s25 + $0x50] sm:$0xff] %vm3691_vm2, %v3605_v11  ;;  %v3606_v22 = vadd.f32 %v3576_v36, %v5408_v57  ;;  %3649 = vrot.lane.b32.xlu1 %v3576_v36, %s4750_s21 }
0x12cc   : > { %3700 = vst.msk [vmem:[%s5584_s25 + $0x40] sm:$0xff] %vm3691_vm2, %v3603_v33  ;;  %v3604_v47 = vadd.f32 %v3568_v38, %v5410_v43 }
0x12cd   : > { %3703 = vst.msk [vmem:[%s5584_s25 + $0x58] sm:$0xff] %vm3691_vm2, %v3606_v22  ;;  %3643 = vrot.lane.b32.xlu0 %v3565_v48, %s4750_s21 }
0x12ce   : > { %3701 = vst.msk [vmem:[%s5584_s25 + $0x48] sm:$0xff] %vm3691_vm2, %v3604_v47  ;;  %v4698_v26 = vpop.f32.mrb[156].mxu1 }
0x12cf   : > { %v3589_v23 = vadd.f32 %v4698_v26, %v5576_v17  ;;  %3645 = vrot.lane.b32.xlu1 %v3568_v38, %s4750_s21  ;;  %v3580_v57 = vpop.f32.mrb[157].mxu1 }
0x12d0   : > { %v3581_v10 = vadd.f32 %v5576_v17, %v3580_v57  ;;  %v4699_v52 = vpop.f32.mrb[158].mxu1 }
0x12d1   : > { %v3609_v43 = vadd.f32 %v3589_v23, %v5429_v34  ;;  %v3592_v54 = vadd.f32 %v4699_v52, %v5576_v17  ;;  %v3583_v18 = vpop.f32.mrb[159].mxu1 }
0x12d2   : > { %v3607_v50 = vadd.f32 %v3581_v10, %v5434_v28  ;;  %v3584_v4 = vadd.f32 %v5576_v17, %v3583_v18  ;;  %3651 = vrot.lane.b32.xlu0 %v3581_v10, %s4750_s21 }
0x12d3   : > { %3706 = vst.msk [vmem:[%s5584_s25 + $0x70] sm:$0xff] %vm3691_vm2, %v3609_v43  ;;  %v3610_v30 = vadd.f32 %v3592_v54, %v5438_v24 }
0x12d4   : > { %3704 = vst.msk [vmem:[%s5584_s25 + $0x60] sm:$0xff] %vm3691_vm2, %v3607_v50  ;;  %v3608_v58 = vadd.f32 %v3584_v4, %v5440_v20  ;;  %3653 = vrot.lane.b32.xlu1 %v3584_v4, %s4750_s21 }
0x12d5   : > { %3707 = vst.msk [vmem:[%s5584_s25 + $0x78] sm:$0xff] %vm3691_vm2, %v3610_v30 }
0x12d6   : > { %3705 = vst.msk [vmem:[%s5584_s25 + $0x68] sm:$0xff] %vm3691_vm2, %v3608_v58  ;;  %3655 = vrot.lane.b32.xlu0 %v3589_v23, %s4750_s21 }
0x12d8   : > { %3657 = vrot.lane.b32.xlu1 %v3592_v54, %s4750_s21 }
0x132a   : > { %v3632_v34 = vpop.permute.xlu0 %3631 }
0x132b   : > { %v3677_v28 = vsub.f32 %v5454_v27, %v3632_v34 }
0x132c   : > { %v3634_v17 = vpop.permute.xlu1 %3633 }
0x132d   : > { %v3678_v24 = vsub.f32 %v5457_v49, %v3634_v17  ;;  %3728 = vrot.lane.b32.xlu0 %v3677_v28, %s4751_s16 }
0x132e   : > { %v3628_v20 = vpop.permute.xlu0 %3627 }
0x132f   : > { %v3675_v21 = vsub.f32 %v5446_v3, %v3628_v20  ;;  %3730 = vrot.lane.b32.xlu1 %v3678_v24, %s4751_s16 }
0x1330   : > { %v3630_v25 = vpop.permute.xlu1 %3629 }
0x1331   : > { %v3676_v1 = vsub.f32 %v5449_v35, %v3630_v25  ;;  %3724 = vrot.lane.b32.xlu0 %v3675_v21, %s4751_s16 }
0x1333   : > { %v3640_v7 = vpop.permute.xlu0 %3639  ;;  %3726 = vrot.lane.b32.xlu1 %v3676_v1, %s4751_s16 }
0x1334   : > { %v3681_v27 = vsub.f32 %v5472_v51, %v3640_v7 }
0x1335   : > { %v3642_v2 = vpop.permute.xlu1 %3641 }
0x1336   : > { %v3682_v49 = vsub.f32 %v5475_v12, %v3642_v2  ;;  %3736 = vrot.lane.b32.xlu0 %v3681_v27, %s4751_s16 }
0x1337   : > { %v3636_v42 = vpop.permute.xlu0 %3635 }
0x1338   : > { %v3679_v3 = vsub.f32 %v5464_v46, %v3636_v42  ;;  %3738 = vrot.lane.b32.xlu1 %v3682_v49, %s4751_s16 }
0x1339   : > { %v3638_v56 = vpop.permute.xlu1 %3637 }
0x133a   : > { %v3680_v35 = vsub.f32 %v5467_v53, %v3638_v56  ;;  %3732 = vrot.lane.b32.xlu0 %v3679_v3, %s4751_s16 }
0x133b   : > { %v3648_v62 = vpop.permute.xlu0 %3647 }
0x133c   : > { %v3685_v40 = vsub.f32 %v5490_v16, %v3648_v62  ;;  %3734 = vrot.lane.b32.xlu1 %v3680_v35, %s4751_s16 }
0x133d   : > { %v3650_v51 = vpop.permute.xlu1 %3649 }
0x133e   : > { %v3686_v12 = vsub.f32 %v5493_v60, %v3650_v51  ;;  %3744 = vrot.lane.b32.xlu0 %v3685_v40, %s4751_s16 }
0x133f   : > { %v3644_v41 = vpop.permute.xlu0 %3643 }
0x1340   : > { %v3683_v46 = vsub.f32 %v5481_v8, %v3644_v41  ;;  %3746 = vrot.lane.b32.xlu1 %v3686_v12, %s4751_s16 }
0x1341   : > { %v3646_v61 = vpop.permute.xlu1 %3645 }
0x1342   : > { %v3684_v53 = vsub.f32 %v5484_v31, %v3646_v61  ;;  %3740 = vrot.lane.b32.xlu0 %v3683_v46, %s4751_s16 }
0x1344   : > { %3742 = vrot.lane.b32.xlu1 %v3684_v53, %s4751_s16  ;;  %v3652_v16 = vpop.permute.xlu0 %3651 }
0x1345   : > { %v3687_v29 = vsub.f32 %v5499_v0, %v3652_v16 }
0x1346   : > { %v3654_v60 = vpop.permute.xlu1 %3653 }
0x1347   : > { %v3688_v5 = vsub.f32 %v5502_v63, %v3654_v60  ;;  %3748 = vrot.lane.b32.xlu0 %v3687_v29, %s4751_s16 }
0x1348   : > { %v3656_v8 = vpop.permute.xlu0 %3655 }
0x1349   : > { %v3689_v59 = vsub.f32 %v5508_v55, %v3656_v8  ;;  %3750 = vrot.lane.b32.xlu1 %v3688_v5, %s4751_s16 }
0x134a   : > { %v3658_v31 = vpop.permute.xlu1 %3657 }
0x134b   : > { %v3690_v32 = vsub.f32 %v5511_v15, %v3658_v31  ;;  %3752 = vrot.lane.b32.xlu0 %v3689_v59, %s4751_s16 }
0x134d   : > { %3754 = vrot.lane.b32.xlu1 %v3690_v32, %s4751_s16 }
0x139f   : > { %v3729_v0 = vpop.permute.xlu0 %3728 }
0x13a0   : > { %3775 = vst.msk [vmem:[%s5584_s25 + $0x10] sm:$0xff] %vm3772_vm3, %v3729_v0 }
0x13a1   : > { %v3731_v63 = vpop.permute.xlu1 %3730 }
0x13a2   : > { %3776 = vst.msk [vmem:[%s5584_s25 + $0x18] sm:$0xff] %vm3772_vm3, %v3731_v63 }
0x13a3   : > { %v3725_v55 = vpop.permute.xlu0 %3724 }
0x13a4   : > { %3773 = vst.msk [vmem:[%s5584_s25] sm:$0xff] %vm3772_vm3, %v3725_v55 }
0x13a5   : > { %v3727_v15 = vpop.permute.xlu1 %3726 }
0x13a6   : > { %3774 = vst.msk [vmem:[%s5584_s25 + $0x8] sm:$0xff] %vm3772_vm3, %v3727_v15 }
0x13a8   : > { %v3737_v9 = vpop.permute.xlu0 %3736 }
0x13a9   : > { %3779 = vst.msk [vmem:[%s5584_s25 + $0x30] sm:$0xff] %vm3772_vm3, %v3737_v9 }
0x13aa   : > { %v3739_v19 = vpop.permute.xlu1 %3738 }
0x13ab   : > { %3780 = vst.msk [vmem:[%s5584_s25 + $0x38] sm:$0xff] %vm3772_vm3, %v3739_v19 }
0x13ac   : > { %v3733_v39 = vpop.permute.xlu0 %3732 }
0x13ad   : > { %3777 = vst.msk [vmem:[%s5584_s25 + $0x20] sm:$0xff] %vm3772_vm3, %v3733_v39 }
0x13ae   : > { %v3735_v44 = vpop.permute.xlu1 %3734 }
0x13af   : > { %3778 = vst.msk [vmem:[%s5584_s25 + $0x28] sm:$0xff] %vm3772_vm3, %v3735_v44 }
0x13b0   : > { %v3745_v37 = vpop.permute.xlu0 %3744 }
0x13b1   : > { %3783 = vst.msk [vmem:[%s5584_s25 + $0x50] sm:$0xff] %vm3772_vm3, %v3745_v37 }
0x13b2   : > { %v3747_v13 = vpop.permute.xlu1 %3746 }
0x13b3   : > { %3784 = vst.msk [vmem:[%s5584_s25 + $0x58] sm:$0xff] %vm3772_vm3, %v3747_v13 }
0x13b4   : > { %v3741_v6 = vpop.permute.xlu0 %3740 }
0x13b5   : > { %3781 = vst.msk [vmem:[%s5584_s25 + $0x40] sm:$0xff] %vm3772_vm3, %v3741_v6 }
0x13b6   : > { %v3743_v48 = vpop.permute.xlu1 %3742 }
0x13b7   : > { %3782 = vst.msk [vmem:[%s5584_s25 + $0x48] sm:$0xff] %vm3772_vm3, %v3743_v48 }
0x13b9   : > { %v3749_v45 = vpop.permute.xlu0 %3748 }
0x13ba   : > { %3785 = vst.msk [vmem:[%s5584_s25 + $0x60] sm:$0xff] %vm3772_vm3, %v3749_v45 }
0x13bb   : > { %v3751_v11 = vpop.permute.xlu1 %3750 }
0x13bc   : > { %3786 = vst.msk [vmem:[%s5584_s25 + $0x68] sm:$0xff] %vm3772_vm3, %v3751_v11 }
0x13bd   : > { %v3753_v36 = vpop.permute.xlu0 %3752 }
0x13be   : > { %3787 = vst.msk [vmem:[%s5584_s25 + $0x70] sm:$0xff] %vm3772_vm3, %v3753_v36 }
0x13bf   : > { %v3755_v14 = vpop.permute.xlu1 %3754 }
0x13c0   : > { %3788 = vst.msk [vmem:[%s5584_s25 + $0x78] sm:$0xff] %vm3772_vm3, %v3755_v14 }
0x13c1 PF: > { %s13_s12 = sadd.s32 1, %s4748_s12  }
0x13c2   : > { %p10_p4 = scmp.ge.s32.totalorder %s13_s12, 4  }
0x13c4   :  { %12 = sbr.rel (!%p10_p4) target bundleno = 1 (0x1), region = 68 }

</bundles_post_ra>
